<compile_context>
chip_gen: v6e
topology: v6e:2x2x1
jax: 0.10.0
libtpu: 0.0.40
codegen_flags: <defaults>
</compile_context>

<pallas_src>
import functools

import jax
import jax.numpy as jnp
from jax import lax
from jax.experimental import pallas as pl
from jax.experimental.pallas import tpu as pltpu


# ---------------------------------------------------------------------------
# Fused kernel: (optional 2x2 maxpool) -> conv3x3+ReLU -> conv3x3+ReLU
# ---------------------------------------------------------------------------
def fused_downsample_kernel(x_ref, w1_ref, b1_ref, w2_ref, b2_ref, o_ref,
                            pad1_ref, pad2_ref,
                            *, H, W, Wp, cin, cout, is_pool):
    f32 = jnp.float32
    bf16 = jnp.bfloat16
    Le = H * Wp                      # "extended" flattened spatial length (pitch Wp)

    # ---- stage 1: (pool) input -> flat padded, channels-major activation -------
    # pad1 layout: (cin, (H+2)*Wp + 2), row-major over the zero-padded image, so a
    # 3x3 tap (dy,dx) is just a lane-offset slice of length Le.
    pad1_ref[...] = jnp.zeros(pad1_ref.shape, f32)      # border stays zero (SAME pad)

    if is_pool:
        Win = x_ref.shape[3]
        ri = lax.broadcasted_iota(jnp.int32, (Win, W), 0)
        ci = lax.broadcasted_iota(jnp.int32, (Win, W), 1)
        # 0/1 selection matrices: MXU-based even/odd column compaction (exact).
        s_even = (ri == 2 * ci).astype(f32)
        s_odd = (ri == 2 * ci + 1).astype(f32)

    for y in range(H):
        if is_pool:
            r0 = x_ref[0, :, 2 * y, :].astype(f32)          # (cin, Win)
            r1 = x_ref[0, :, 2 * y + 1, :].astype(f32)
            rp = jnp.maximum(r0, r1)                        # row-pair max
            row = jnp.maximum(                              # column-pair max + compaction
                jnp.dot(rp, s_even, preferred_element_type=f32),
                jnp.dot(rp, s_odd, preferred_element_type=f32))   # (cin, W)
        else:
            row = x_ref[0, :, y, :].astype(f32)             # (cin, W)
        start = (y + 1) * Wp + 1
        pad1_ref[:, start:start + W] = row

    # ---- 3x3 conv as 9 accumulating channels-major MXU matmuls (bf16 -> f32) ---
    def conv3x3_relu(pad_ref, w_ref, b_ref):
        acc = None
        for dy in range(3):
            for dx in range(3):
                off = dy * Wp + dx
                a = pad_ref[:, off:off + Le].astype(bf16)        # (c_in, Le)
                wt = w_ref[dy * 3 + dx]                          # (c_out, c_in) bf16
                p = jnp.dot(wt, a, preferred_element_type=f32)   # (c_out, Le) f32
                acc = p if acc is None else acc + p
        return jnp.maximum(acc + b_ref[...], 0.0)                # bias + ReLU in f32

    y1 = conv3x3_relu(pad1_ref, w1_ref, b1_ref)                  # (cout, Le)

    # ---- stage 1 -> stage 2 hand-off: one lane-dense offset copy ---------------
    head = Wp + 1
    pad2_ref[:, :head] = jnp.zeros((cout, head), f32)            # top pad row (+ first left pad)
    pad2_ref[:, head + Le:] = jnp.zeros((cout, head), f32)       # bottom pad row (+ tail)
    pad2_ref[:, head:head + Le] = y1                             # whole interior in one store
    # The 2 "extended" junk columns of each row landed on conv2's left/right pad
    # cells; zero them so they act as the SAME padding (2 lanes per row, contiguous).
    for y in range(H):
        z = (y + 1) * Wp + W + 1
        pad2_ref[:, z:z + 2] = jnp.zeros((cout, 2), f32)

    y2 = conv3x3_relu(pad2_ref, w2_ref, b2_ref)                  # (cout, Le)
    o_ref[0] = y2.astype(o_ref.dtype)


# ---------------------------------------------------------------------------
# Wrapper: NCHW in / NCHW out (matches Downsample.forward)
# ---------------------------------------------------------------------------
@functools.partial(jax.jit, static_argnames=("is_pool",))
def downsample_forward(x_nchw, params, is_pool=True):
    N, cin, Hin, Win = x_nchw.shape
    cout = params["w1"].shape[-1]
    if is_pool:
        H, W = Hin // 2, Win // 2        # PyTorch MaxPool2d floors odd sizes
    else:
        H, W = Hin, Win
    Wp = W + 2                            # padded row pitch
    Le = H * Wp                           # extended flattened spatial length
    Lp = (H + 2) * Wp + 2                 # flat padded buffer length

    # Weights pre-shaped once to per-tap channels-major matmul layout, bf16 for MXU.
    w1 = jnp.transpose(params["w1"], (0, 1, 3, 2)).reshape(9, cout, cin).astype(jnp.bfloat16)
    w2 = jnp.transpose(params["w2"], (0, 1, 3, 2)).reshape(9, cout, cout).astype(jnp.bfloat16)
    b1 = params["b1"].reshape(cout, 1).astype(jnp.float32)
    b2 = params["b2"].reshape(cout, 1).astype(jnp.float32)

    kernel = functools.partial(fused_downsample_kernel, H=H, W=W, Wp=Wp,
                               cin=cin, cout=cout, is_pool=is_pool)

    out_ext = pl.pallas_call(
        kernel,
        out_shape=jax.ShapeDtypeStruct((N, cout, Le), x_nchw.dtype),
        grid=(N,),
        in_specs=[
            pl.BlockSpec((1, cin, Hin, Win), lambda n: (n, 0, 0, 0)),  # raw NCHW image
            pl.BlockSpec((9, cout, cin), lambda n: (0, 0, 0)),
            pl.BlockSpec((cout, 1), lambda n: (0, 0)),
            pl.BlockSpec((9, cout, cout), lambda n: (0, 0, 0)),
            pl.BlockSpec((cout, 1), lambda n: (0, 0)),
        ],
        out_specs=pl.BlockSpec((1, cout, Le), lambda n: (n, 0, 0)),
        scratch_shapes=[
            pltpu.VMEM((cin, Lp), jnp.float32),    # flat padded (pooled) input
            pltpu.VMEM((cout, Lp), jnp.float32),   # flat padded conv1 activation
        ],
        compiler_params=pltpu.CompilerParams(
            dimension_semantics=("parallel",)),    # batch shards across v7x's 2 TCs
    )(x_nchw, w1, b1, w2, b2)

    # Free metadata reshape + cheap slice dropping the 2 extended columns -> NCHW.
    return out_ext.reshape(N, cout, H, Wp)[:, :, :, :W]


# ---------------------------------------------------------------------------
# Parameter init (mimics PyTorch Conv2d default U(-sqrt(k), sqrt(k)))
# ---------------------------------------------------------------------------
def init_params(key, in_channels, out_channels):
    k1, k2, k3, k4 = jax.random.split(key, 4)

    def conv_init(kw, kb, cin, cout):
        bound = 1.0 / float(cin * 9) ** 0.5
        w = jax.random.uniform(kw, (3, 3, cin, cout), jnp.float32, -bound, bound)
        b = jax.random.uniform(kb, (cout,), jnp.float32, -bound, bound)
        return w, b

    w1, b1 = conv_init(k1, k2, in_channels, out_channels)
    w2, b2 = conv_init(k3, k4, out_channels, out_channels)
    return {"w1": w1, "b1": b1, "w2": w2, "b2": b2}


# ---------------------------------------------------------------------------
# Pure-JAX reference (for correctness check)
# ---------------------------------------------------------------------------
def ref_forward(x_nchw, params, is_pool=True):
    x = x_nchw
    if is_pool:
        x = lax.reduce_window(x, -jnp.inf, lax.max, (1, 1, 2, 2), (1, 1, 2, 2), "VALID")
    for w, b in ((params["w1"], params["b1"]), (params["w2"], params["b2"])):
        y = lax.conv_general_dilated(
            x, w, window_strides=(1, 1), padding="SAME",
            dimension_numbers=("NCHW", "HWIO", "NCHW"),
        )
        x = jnp.maximum(y + b.reshape(1, -1, 1, 1), 0.0)
    return x


# ---------------------------------------------------------------------------
if __name__ == "__main__":
    key = jax.random.PRNGKey(0)
    k_param, k_x = jax.random.split(key)

    in_channels, out_channels = 4, 8
    params = init_params(k_param, in_channels, out_channels)

    x = jax.random.normal(k_x, (2, in_channels, 16, 16), dtype=jnp.float32)  # NCHW

    for is_pool in (True, False):
        out = jax.block_until_ready(downsample_forward(x, params, is_pool=is_pool))
        ref = jax.block_until_ready(ref_forward(x, params, is_pool=is_pool))
        assert out.shape == ref.shape, (out.shape, ref.shape)
        err = float(jnp.max(jnp.abs(out - ref)))
        # bf16 MXU operands (f32 accumulation) -> loosened tolerance vs f32 reference.
        assert err < 5e-2, f"mismatch (is_pool={is_pool}): max abs err {err}"

    print("KERNEL_OK")
</pallas_src>

<mosaic_0001>
module attributes {stable_mosaic.version = 11 : i64} {
  func.func @fused_downsample_kernel(%arg0: i32, %arg1: memref<1x4x16x16xf32, #tpu.memory_space<vmem>>, %arg2: memref<9x8x4xbf16, #tpu.memory_space<vmem>>, %arg3: memref<8x1xf32, #tpu.memory_space<vmem>>, %arg4: memref<9x8x8xbf16, #tpu.memory_space<vmem>>, %arg5: memref<8x1xf32, #tpu.memory_space<vmem>>, %arg6: memref<1x8x80xf32, #tpu.memory_space<vmem>>, %arg7: memref<4x102xf32, #tpu.memory_space<vmem>>, %arg8: memref<8x102xf32, #tpu.memory_space<vmem>>) attributes {dimension_semantics = [#tpu.dimension_semantics<parallel>], iteration_bounds = array<i64: 2>, scalar_prefetch = 0 : i64, scratch_operands = 2 : i64, tpu.core_type = #tpu.core_type<tc>, window_params = [{transform_indices = @transform_0, window_bounds = array<i64: 1, 4, 16, 16>}, {pipeline_mode = #tpu.pipeline_mode<synchronous>, transform_indices = @transform_1, window_bounds = array<i64: 9, 8, 4>}, {pipeline_mode = #tpu.pipeline_mode<synchronous>, transform_indices = @transform_2, window_bounds = array<i64: 8, 1>}, {pipeline_mode = #tpu.pipeline_mode<synchronous>, transform_indices = @transform_3, window_bounds = array<i64: 9, 8, 8>}, {pipeline_mode = #tpu.pipeline_mode<synchronous>, transform_indices = @transform_4, window_bounds = array<i64: 8, 1>}, {transform_indices = @transform_5, window_bounds = array<i64: 1, 8, 80>}]} {
    %cst = arith.constant 0.000000e+00 : f32
    %0 = vector.broadcast %cst : f32 to vector<4x102xf32>
    %c0 = arith.constant 0 : index
    %c0_0 = arith.constant 0 : index
    %1 = vector.load %arg7[%c0, %c0_0] : memref<4x102xf32, #tpu.memory_space<vmem>>, vector<4x102xf32>
    tpu.vector_store %arg7[%c0, %c0_0], %0 {strides = array<i32>} : memref<4x102xf32, #tpu.memory_space<vmem>>, vector<4x102xf32>,
    %2 = tpu.iota {dimensions = array<i32: 0>} : vector<16x8xi32>
    %3 = tpu.iota {dimensions = array<i32: 1>} : vector<16x8xi32>
    %c2_i32 = arith.constant 2 : i32
    %4 = vector.broadcast %c2_i32 : i32 to vector<16x8xi32>
    %5 = arith.muli %4, %3 : vector<16x8xi32>
    %6 = arith.cmpi eq, %2, %5 : vector<16x8xi32>
    %7 = arith.extui %6 : vector<16x8xi1> to vector<16x8xi32>
    %8 = arith.sitofp %7 : vector<16x8xi32> to vector<16x8xf32>
    %c2_i32_1 = arith.constant 2 : i32
    %9 = vector.broadcast %c2_i32_1 : i32 to vector<16x8xi32>
    %10 = arith.muli %9, %3 : vector<16x8xi32>
    %c1_i32 = arith.constant 1 : i32
    %11 = vector.broadcast %c1_i32 : i32 to vector<16x8xi32>
    %12 = arith.addi %10, %11 : vector<16x8xi32>
    %13 = arith.cmpi eq, %2, %12 : vector<16x8xi32>
    %14 = arith.extui %13 : vector<16x8xi1> to vector<16x8xi32>
    %15 = arith.sitofp %14 : vector<16x8xi32> to vector<16x8xf32>
    %c0_2 = arith.constant 0 : index
    %c0_3 = arith.constant 0 : index
    %c0_4 = arith.constant 0 : index
    %c0_5 = arith.constant 0 : index
    %16 = vector.load %arg1[%c0_2, %c0_3, %c0_4, %c0_5] : memref<1x4x16x16xf32, #tpu.memory_space<vmem>>, vector<1x4x1x16xf32>
    %17 = vector.shape_cast %16 : vector<1x4x1x16xf32> to vector<4x16xf32>
    %c0_6 = arith.constant 0 : index
    %c0_7 = arith.constant 0 : index
    %c1 = arith.constant 1 : index
    %c0_8 = arith.constant 0 : index
    %18 = vector.load %arg1[%c0_6, %c0_7, %c1, %c0_8] : memref<1x4x16x16xf32, #tpu.memory_space<vmem>>, vector<1x4x1x16xf32>
    %19 = vector.shape_cast %18 : vector<1x4x1x16xf32> to vector<4x16xf32>
    %20 = arith.maximumf %17, %19 : vector<4x16xf32>
    %cst_9 = arith.constant dense<0.000000e+00> : vector<4x8xf32>
    %21 = tpu.matmul %20, %8, %cst_9 {dimension_numbers = #tpu.dot_dimension_numbers<[1], [0], [0], [1], [0, 0, 1, 1], [], []>} : vector<4x16xf32>, vector<16x8xf32>, vector<4x8xf32> -> vector<4x8xf32>
    %cst_10 = arith.constant dense<0.000000e+00> : vector<4x8xf32>
    %22 = tpu.matmul %20, %15, %cst_10 {dimension_numbers = #tpu.dot_dimension_numbers<[1], [0], [0], [1], [0, 0, 1, 1], [], []>} : vector<4x16xf32>, vector<16x8xf32>, vector<4x8xf32> -> vector<4x8xf32>
    %23 = arith.maximumf %21, %22 : vector<4x8xf32>
    %c0_11 = arith.constant 0 : index
    %c11 = arith.constant 11 : index
    %24 = vector.load %arg7[%c0_11, %c11] : memref<4x102xf32, #tpu.memory_space<vmem>>, vector<4x8xf32>
    tpu.vector_store %arg7[%c0_11, %c11], %23 {strides = array<i32>} : memref<4x102xf32, #tpu.memory_space<vmem>>, vector<4x8xf32>,
    %c0_12 = arith.constant 0 : index
    %c0_13 = arith.constant 0 : index
    %c2 = arith.constant 2 : index
    %c0_14 = arith.constant 0 : index
    %25 = vector.load %arg1[%c0_12, %c0_13, %c2, %c0_14] : memref<1x4x16x16xf32, #tpu.memory_space<vmem>>, vector<1x4x1x16xf32>
    %26 = vector.shape_cast %25 : vector<1x4x1x16xf32> to vector<4x16xf32>
    %c0_15 = arith.constant 0 : index
    %c0_16 = arith.constant 0 : index
    %c3 = arith.constant 3 : index
    %c0_17 = arith.constant 0 : index
    %27 = vector.load %arg1[%c0_15, %c0_16, %c3, %c0_17] : memref<1x4x16x16xf32, #tpu.memory_space<vmem>>, vector<1x4x1x16xf32>
    %28 = vector.shape_cast %27 : vector<1x4x1x16xf32> to vector<4x16xf32>
    %29 = arith.maximumf %26, %28 : vector<4x16xf32>
    %cst_18 = arith.constant dense<0.000000e+00> : vector<4x8xf32>
    %30 = tpu.matmul %29, %8, %cst_18 {dimension_numbers = #tpu.dot_dimension_numbers<[1], [0], [0], [1], [0, 0, 1, 1], [], []>} : vector<4x16xf32>, vector<16x8xf32>, vector<4x8xf32> -> vector<4x8xf32>
    %cst_19 = arith.constant dense<0.000000e+00> : vector<4x8xf32>
    %31 = tpu.matmul %29, %15, %cst_19 {dimension_numbers = #tpu.dot_dimension_numbers<[1], [0], [0], [1], [0, 0, 1, 1], [], []>} : vector<4x16xf32>, vector<16x8xf32>, vector<4x8xf32> -> vector<4x8xf32>
    %32 = arith.maximumf %30, %31 : vector<4x8xf32>
    %c0_20 = arith.constant 0 : index
    %c21 = arith.constant 21 : index
    %33 = vector.load %arg7[%c0_20, %c21] : memref<4x102xf32, #tpu.memory_space<vmem>>, vector<4x8xf32>
    tpu.vector_store %arg7[%c0_20, %c21], %32 {strides = array<i32>} : memref<4x102xf32, #tpu.memory_space<vmem>>, vector<4x8xf32>,
    %c0_21 = arith.constant 0 : index
    %c0_22 = arith.constant 0 : index
    %c4 = arith.constant 4 : index
    %c0_23 = arith.constant 0 : index
    %34 = vector.load %arg1[%c0_21, %c0_22, %c4, %c0_23] : memref<1x4x16x16xf32, #tpu.memory_space<vmem>>, vector<1x4x1x16xf32>
    %35 = vector.shape_cast %34 : vector<1x4x1x16xf32> to vector<4x16xf32>
    %c0_24 = arith.constant 0 : index
    %c0_25 = arith.constant 0 : index
    %c5 = arith.constant 5 : index
    %c0_26 = arith.constant 0 : index
    %36 = vector.load %arg1[%c0_24, %c0_25, %c5, %c0_26] : memref<1x4x16x16xf32, #tpu.memory_space<vmem>>, vector<1x4x1x16xf32>
    %37 = vector.shape_cast %36 : vector<1x4x1x16xf32> to vector<4x16xf32>
    %38 = arith.maximumf %35, %37 : vector<4x16xf32>
    %cst_27 = arith.constant dense<0.000000e+00> : vector<4x8xf32>
    %39 = tpu.matmul %38, %8, %cst_27 {dimension_numbers = #tpu.dot_dimension_numbers<[1], [0], [0], [1], [0, 0, 1, 1], [], []>} : vector<4x16xf32>, vector<16x8xf32>, vector<4x8xf32> -> vector<4x8xf32>
    %cst_28 = arith.constant dense<0.000000e+00> : vector<4x8xf32>
    %40 = tpu.matmul %38, %15, %cst_28 {dimension_numbers = #tpu.dot_dimension_numbers<[1], [0], [0], [1], [0, 0, 1, 1], [], []>} : vector<4x16xf32>, vector<16x8xf32>, vector<4x8xf32> -> vector<4x8xf32>
    %41 = arith.maximumf %39, %40 : vector<4x8xf32>
    %c0_29 = arith.constant 0 : index
    %c31 = arith.constant 31 : index
    %42 = vector.load %arg7[%c0_29, %c31] : memref<4x102xf32, #tpu.memory_space<vmem>>, vector<4x8xf32>
    tpu.vector_store %arg7[%c0_29, %c31], %41 {strides = array<i32>} : memref<4x102xf32, #tpu.memory_space<vmem>>, vector<4x8xf32>,
    %c0_30 = arith.constant 0 : index
    %c0_31 = arith.constant 0 : index
    %c6 = arith.constant 6 : index
    %c0_32 = arith.constant 0 : index
    %43 = vector.load %arg1[%c0_30, %c0_31, %c6, %c0_32] : memref<1x4x16x16xf32, #tpu.memory_space<vmem>>, vector<1x4x1x16xf32>
    %44 = vector.shape_cast %43 : vector<1x4x1x16xf32> to vector<4x16xf32>
    %c0_33 = arith.constant 0 : index
    %c0_34 = arith.constant 0 : index
    %c7 = arith.constant 7 : index
    %c0_35 = arith.constant 0 : index
    %45 = vector.load %arg1[%c0_33, %c0_34, %c7, %c0_35] : memref<1x4x16x16xf32, #tpu.memory_space<vmem>>, vector<1x4x1x16xf32>
    %46 = vector.shape_cast %45 : vector<1x4x1x16xf32> to vector<4x16xf32>
    %47 = arith.maximumf %44, %46 : vector<4x16xf32>
    %cst_36 = arith.constant dense<0.000000e+00> : vector<4x8xf32>
    %48 = tpu.matmul %47, %8, %cst_36 {dimension_numbers = #tpu.dot_dimension_numbers<[1], [0], [0], [1], [0, 0, 1, 1], [], []>} : vector<4x16xf32>, vector<16x8xf32>, vector<4x8xf32> -> vector<4x8xf32>
    %cst_37 = arith.constant dense<0.000000e+00> : vector<4x8xf32>
    %49 = tpu.matmul %47, %15, %cst_37 {dimension_numbers = #tpu.dot_dimension_numbers<[1], [0], [0], [1], [0, 0, 1, 1], [], []>} : vector<4x16xf32>, vector<16x8xf32>, vector<4x8xf32> -> vector<4x8xf32>
    %50 = arith.maximumf %48, %49 : vector<4x8xf32>
    %c0_38 = arith.constant 0 : index
    %c41 = arith.constant 41 : index
    %51 = vector.load %arg7[%c0_38, %c41] : memref<4x102xf32, #tpu.memory_space<vmem>>, vector<4x8xf32>
    tpu.vector_store %arg7[%c0_38, %c41], %50 {strides = array<i32>} : memref<4x102xf32, #tpu.memory_space<vmem>>, vector<4x8xf32>,
    %c0_39 = arith.constant 0 : index
    %c0_40 = arith.constant 0 : index
    %c8 = arith.constant 8 : index
    %c0_41 = arith.constant 0 : index
    %52 = vector.load %arg1[%c0_39, %c0_40, %c8, %c0_41] : memref<1x4x16x16xf32, #tpu.memory_space<vmem>>, vector<1x4x1x16xf32>
    %53 = vector.shape_cast %52 : vector<1x4x1x16xf32> to vector<4x16xf32>
    %c0_42 = arith.constant 0 : index
    %c0_43 = arith.constant 0 : index
    %c9 = arith.constant 9 : index
    %c0_44 = arith.constant 0 : index
    %54 = vector.load %arg1[%c0_42, %c0_43, %c9, %c0_44] : memref<1x4x16x16xf32, #tpu.memory_space<vmem>>, vector<1x4x1x16xf32>
    %55 = vector.shape_cast %54 : vector<1x4x1x16xf32> to vector<4x16xf32>
    %56 = arith.maximumf %53, %55 : vector<4x16xf32>
    %cst_45 = arith.constant dense<0.000000e+00> : vector<4x8xf32>
    %57 = tpu.matmul %56, %8, %cst_45 {dimension_numbers = #tpu.dot_dimension_numbers<[1], [0], [0], [1], [0, 0, 1, 1], [], []>} : vector<4x16xf32>, vector<16x8xf32>, vector<4x8xf32> -> vector<4x8xf32>
    %cst_46 = arith.constant dense<0.000000e+00> : vector<4x8xf32>
    %58 = tpu.matmul %56, %15, %cst_46 {dimension_numbers = #tpu.dot_dimension_numbers<[1], [0], [0], [1], [0, 0, 1, 1], [], []>} : vector<4x16xf32>, vector<16x8xf32>, vector<4x8xf32> -> vector<4x8xf32>
    %59 = arith.maximumf %57, %58 : vector<4x8xf32>
    %c0_47 = arith.constant 0 : index
    %c51 = arith.constant 51 : index
    %60 = vector.load %arg7[%c0_47, %c51] : memref<4x102xf32, #tpu.memory_space<vmem>>, vector<4x8xf32>
    tpu.vector_store %arg7[%c0_47, %c51], %59 {strides = array<i32>} : memref<4x102xf32, #tpu.memory_space<vmem>>, vector<4x8xf32>,
    %c0_48 = arith.constant 0 : index
    %c0_49 = arith.constant 0 : index
    %c10 = arith.constant 10 : index
    %c0_50 = arith.constant 0 : index
    %61 = vector.load %arg1[%c0_48, %c0_49, %c10, %c0_50] : memref<1x4x16x16xf32, #tpu.memory_space<vmem>>, vector<1x4x1x16xf32>
    %62 = vector.shape_cast %61 : vector<1x4x1x16xf32> to vector<4x16xf32>
    %c0_51 = arith.constant 0 : index
    %c0_52 = arith.constant 0 : index
    %c11_53 = arith.constant 11 : index
    %c0_54 = arith.constant 0 : index
    %63 = vector.load %arg1[%c0_51, %c0_52, %c11_53, %c0_54] : memref<1x4x16x16xf32, #tpu.memory_space<vmem>>, vector<1x4x1x16xf32>
    %64 = vector.shape_cast %63 : vector<1x4x1x16xf32> to vector<4x16xf32>
    %65 = arith.maximumf %62, %64 : vector<4x16xf32>
    %cst_55 = arith.constant dense<0.000000e+00> : vector<4x8xf32>
    %66 = tpu.matmul %65, %8, %cst_55 {dimension_numbers = #tpu.dot_dimension_numbers<[1], [0], [0], [1], [0, 0, 1, 1], [], []>} : vector<4x16xf32>, vector<16x8xf32>, vector<4x8xf32> -> vector<4x8xf32>
    %cst_56 = arith.constant dense<0.000000e+00> : vector<4x8xf32>
    %67 = tpu.matmul %65, %15, %cst_56 {dimension_numbers = #tpu.dot_dimension_numbers<[1], [0], [0], [1], [0, 0, 1, 1], [], []>} : vector<4x16xf32>, vector<16x8xf32>, vector<4x8xf32> -> vector<4x8xf32>
    %68 = arith.maximumf %66, %67 : vector<4x8xf32>
    %c0_57 = arith.constant 0 : index
    %c61 = arith.constant 61 : index
    %69 = vector.load %arg7[%c0_57, %c61] : memref<4x102xf32, #tpu.memory_space<vmem>>, vector<4x8xf32>
    tpu.vector_store %arg7[%c0_57, %c61], %68 {strides = array<i32>} : memref<4x102xf32, #tpu.memory_space<vmem>>, vector<4x8xf32>,
    %c0_58 = arith.constant 0 : index
    %c0_59 = arith.constant 0 : index
    %c12 = arith.constant 12 : index
    %c0_60 = arith.constant 0 : index
    %70 = vector.load %arg1[%c0_58, %c0_59, %c12, %c0_60] : memref<1x4x16x16xf32, #tpu.memory_space<vmem>>, vector<1x4x1x16xf32>
    %71 = vector.shape_cast %70 : vector<1x4x1x16xf32> to vector<4x16xf32>
    %c0_61 = arith.constant 0 : index
    %c0_62 = arith.constant 0 : index
    %c13 = arith.constant 13 : index
    %c0_63 = arith.constant 0 : index
    %72 = vector.load %arg1[%c0_61, %c0_62, %c13, %c0_63] : memref<1x4x16x16xf32, #tpu.memory_space<vmem>>, vector<1x4x1x16xf32>
    %73 = vector.shape_cast %72 : vector<1x4x1x16xf32> to vector<4x16xf32>
    %74 = arith.maximumf %71, %73 : vector<4x16xf32>
    %cst_64 = arith.constant dense<0.000000e+00> : vector<4x8xf32>
    %75 = tpu.matmul %74, %8, %cst_64 {dimension_numbers = #tpu.dot_dimension_numbers<[1], [0], [0], [1], [0, 0, 1, 1], [], []>} : vector<4x16xf32>, vector<16x8xf32>, vector<4x8xf32> -> vector<4x8xf32>
    %cst_65 = arith.constant dense<0.000000e+00> : vector<4x8xf32>
    %76 = tpu.matmul %74, %15, %cst_65 {dimension_numbers = #tpu.dot_dimension_numbers<[1], [0], [0], [1], [0, 0, 1, 1], [], []>} : vector<4x16xf32>, vector<16x8xf32>, vector<4x8xf32> -> vector<4x8xf32>
    %77 = arith.maximumf %75, %76 : vector<4x8xf32>
    %c0_66 = arith.constant 0 : index
    %c71 = arith.constant 71 : index
    %78 = vector.load %arg7[%c0_66, %c71] : memref<4x102xf32, #tpu.memory_space<vmem>>, vector<4x8xf32>
    tpu.vector_store %arg7[%c0_66, %c71], %77 {strides = array<i32>} : memref<4x102xf32, #tpu.memory_space<vmem>>, vector<4x8xf32>,
    %c0_67 = arith.constant 0 : index
    %c0_68 = arith.constant 0 : index
    %c14 = arith.constant 14 : index
    %c0_69 = arith.constant 0 : index
    %79 = vector.load %arg1[%c0_67, %c0_68, %c14, %c0_69] : memref<1x4x16x16xf32, #tpu.memory_space<vmem>>, vector<1x4x1x16xf32>
    %80 = vector.shape_cast %79 : vector<1x4x1x16xf32> to vector<4x16xf32>
    %c0_70 = arith.constant 0 : index
    %c0_71 = arith.constant 0 : index
    %c15 = arith.constant 15 : index
    %c0_72 = arith.constant 0 : index
    %81 = vector.load %arg1[%c0_70, %c0_71, %c15, %c0_72] : memref<1x4x16x16xf32, #tpu.memory_space<vmem>>, vector<1x4x1x16xf32>
    %82 = vector.shape_cast %81 : vector<1x4x1x16xf32> to vector<4x16xf32>
    %83 = arith.maximumf %80, %82 : vector<4x16xf32>
    %cst_73 = arith.constant dense<0.000000e+00> : vector<4x8xf32>
    %84 = tpu.matmul %83, %8, %cst_73 {dimension_numbers = #tpu.dot_dimension_numbers<[1], [0], [0], [1], [0, 0, 1, 1], [], []>} : vector<4x16xf32>, vector<16x8xf32>, vector<4x8xf32> -> vector<4x8xf32>
    %cst_74 = arith.constant dense<0.000000e+00> : vector<4x8xf32>
    %85 = tpu.matmul %83, %15, %cst_74 {dimension_numbers = #tpu.dot_dimension_numbers<[1], [0], [0], [1], [0, 0, 1, 1], [], []>} : vector<4x16xf32>, vector<16x8xf32>, vector<4x8xf32> -> vector<4x8xf32>
    %86 = arith.maximumf %84, %85 : vector<4x8xf32>
    %c0_75 = arith.constant 0 : index
    %c81 = arith.constant 81 : index
    %87 = vector.load %arg7[%c0_75, %c81] : memref<4x102xf32, #tpu.memory_space<vmem>>, vector<4x8xf32>
    tpu.vector_store %arg7[%c0_75, %c81], %86 {strides = array<i32>} : memref<4x102xf32, #tpu.memory_space<vmem>>, vector<4x8xf32>,
    %c0_76 = arith.constant 0 : index
    %c0_77 = arith.constant 0 : index
    %88 = vector.load %arg7[%c0_76, %c0_77] : memref<4x102xf32, #tpu.memory_space<vmem>>, vector<4x80xf32>
    %89 = arith.truncf %88 : vector<4x80xf32> to vector<4x80xbf16>
    %c0_78 = arith.constant 0 : index
    %c0_79 = arith.constant 0 : index
    %c0_80 = arith.constant 0 : index
    %90 = vector.load %arg2[%c0_78, %c0_79, %c0_80] : memref<9x8x4xbf16, #tpu.memory_space<vmem>>, vector<1x8x4xbf16>
    %91 = vector.shape_cast %90 : vector<1x8x4xbf16> to vector<8x4xbf16>
    %cst_81 = arith.constant dense<0.000000e+00> : vector<8x80xf32>
    %92 = tpu.matmul %91, %89, %cst_81 {dimension_numbers = #tpu.dot_dimension_numbers<[1], [0], [0], [1], [0, 0, 1, 1], [], []>} : vector<8x4xbf16>, vector<4x80xbf16>, vector<8x80xf32> -> vector<8x80xf32>
    %c0_82 = arith.constant 0 : index
    %c1_83 = arith.constant 1 : index
    %93 = vector.load %arg7[%c0_82, %c1_83] : memref<4x102xf32, #tpu.memory_space<vmem>>, vector<4x80xf32>
    %94 = arith.truncf %93 : vector<4x80xf32> to vector<4x80xbf16>
    %c1_84 = arith.constant 1 : index
    %c0_85 = arith.constant 0 : index
    %c0_86 = arith.constant 0 : index
    %95 = vector.load %arg2[%c1_84, %c0_85, %c0_86] : memref<9x8x4xbf16, #tpu.memory_space<vmem>>, vector<1x8x4xbf16>
    %96 = vector.shape_cast %95 : vector<1x8x4xbf16> to vector<8x4xbf16>
    %cst_87 = arith.constant dense<0.000000e+00> : vector<8x80xf32>
    %97 = tpu.matmul %96, %94, %cst_87 {dimension_numbers = #tpu.dot_dimension_numbers<[1], [0], [0], [1], [0, 0, 1, 1], [], []>} : vector<8x4xbf16>, vector<4x80xbf16>, vector<8x80xf32> -> vector<8x80xf32>
    %98 = arith.addf %92, %97 : vector<8x80xf32>
    %c0_88 = arith.constant 0 : index
    %c2_89 = arith.constant 2 : index
    %99 = vector.load %arg7[%c0_88, %c2_89] : memref<4x102xf32, #tpu.memory_space<vmem>>, vector<4x80xf32>
    %100 = arith.truncf %99 : vector<4x80xf32> to vector<4x80xbf16>
    %c2_90 = arith.constant 2 : index
    %c0_91 = arith.constant 0 : index
    %c0_92 = arith.constant 0 : index
    %101 = vector.load %arg2[%c2_90, %c0_91, %c0_92] : memref<9x8x4xbf16, #tpu.memory_space<vmem>>, vector<1x8x4xbf16>
    %102 = vector.shape_cast %101 : vector<1x8x4xbf16> to vector<8x4xbf16>
    %cst_93 = arith.constant dense<0.000000e+00> : vector<8x80xf32>
    %103 = tpu.matmul %102, %100, %cst_93 {dimension_numbers = #tpu.dot_dimension_numbers<[1], [0], [0], [1], [0, 0, 1, 1], [], []>} : vector<8x4xbf16>, vector<4x80xbf16>, vector<8x80xf32> -> vector<8x80xf32>
    %104 = arith.addf %98, %103 : vector<8x80xf32>
    %c0_94 = arith.constant 0 : index
    %c10_95 = arith.constant 10 : index
    %105 = vector.load %arg7[%c0_94, %c10_95] : memref<4x102xf32, #tpu.memory_space<vmem>>, vector<4x80xf32>
    %106 = arith.truncf %105 : vector<4x80xf32> to vector<4x80xbf16>
    %c3_96 = arith.constant 3 : index
    %c0_97 = arith.constant 0 : index
    %c0_98 = arith.constant 0 : index
    %107 = vector.load %arg2[%c3_96, %c0_97, %c0_98] : memref<9x8x4xbf16, #tpu.memory_space<vmem>>, vector<1x8x4xbf16>
    %108 = vector.shape_cast %107 : vector<1x8x4xbf16> to vector<8x4xbf16>
    %cst_99 = arith.constant dense<0.000000e+00> : vector<8x80xf32>
    %109 = tpu.matmul %108, %106, %cst_99 {dimension_numbers = #tpu.dot_dimension_numbers<[1], [0], [0], [1], [0, 0, 1, 1], [], []>} : vector<8x4xbf16>, vector<4x80xbf16>, vector<8x80xf32> -> vector<8x80xf32>
    %110 = arith.addf %104, %109 : vector<8x80xf32>
    %c0_100 = arith.constant 0 : index
    %c11_101 = arith.constant 11 : index
    %111 = vector.load %arg7[%c0_100, %c11_101] : memref<4x102xf32, #tpu.memory_space<vmem>>, vector<4x80xf32>
    %112 = arith.truncf %111 : vector<4x80xf32> to vector<4x80xbf16>
    %c4_102 = arith.constant 4 : index
    %c0_103 = arith.constant 0 : index
    %c0_104 = arith.constant 0 : index
    %113 = vector.load %arg2[%c4_102, %c0_103, %c0_104] : memref<9x8x4xbf16, #tpu.memory_space<vmem>>, vector<1x8x4xbf16>
    %114 = vector.shape_cast %113 : vector<1x8x4xbf16> to vector<8x4xbf16>
    %cst_105 = arith.constant dense<0.000000e+00> : vector<8x80xf32>
    %115 = tpu.matmul %114, %112, %cst_105 {dimension_numbers = #tpu.dot_dimension_numbers<[1], [0], [0], [1], [0, 0, 1, 1], [], []>} : vector<8x4xbf16>, vector<4x80xbf16>, vector<8x80xf32> -> vector<8x80xf32>
    %116 = arith.addf %110, %115 : vector<8x80xf32>
    %c0_106 = arith.constant 0 : index
    %c12_107 = arith.constant 12 : index
    %117 = vector.load %arg7[%c0_106, %c12_107] : memref<4x102xf32, #tpu.memory_space<vmem>>, vector<4x80xf32>
    %118 = arith.truncf %117 : vector<4x80xf32> to vector<4x80xbf16>
    %c5_108 = arith.constant 5 : index
    %c0_109 = arith.constant 0 : index
    %c0_110 = arith.constant 0 : index
    %119 = vector.load %arg2[%c5_108, %c0_109, %c0_110] : memref<9x8x4xbf16, #tpu.memory_space<vmem>>, vector<1x8x4xbf16>
    %120 = vector.shape_cast %119 : vector<1x8x4xbf16> to vector<8x4xbf16>
    %cst_111 = arith.constant dense<0.000000e+00> : vector<8x80xf32>
    %121 = tpu.matmul %120, %118, %cst_111 {dimension_numbers = #tpu.dot_dimension_numbers<[1], [0], [0], [1], [0, 0, 1, 1], [], []>} : vector<8x4xbf16>, vector<4x80xbf16>, vector<8x80xf32> -> vector<8x80xf32>
    %122 = arith.addf %116, %121 : vector<8x80xf32>
    %c0_112 = arith.constant 0 : index
    %c20 = arith.constant 20 : index
    %123 = vector.load %arg7[%c0_112, %c20] : memref<4x102xf32, #tpu.memory_space<vmem>>, vector<4x80xf32>
    %124 = arith.truncf %123 : vector<4x80xf32> to vector<4x80xbf16>
    %c6_113 = arith.constant 6 : index
    %c0_114 = arith.constant 0 : index
    %c0_115 = arith.constant 0 : index
    %125 = vector.load %arg2[%c6_113, %c0_114, %c0_115] : memref<9x8x4xbf16, #tpu.memory_space<vmem>>, vector<1x8x4xbf16>
    %126 = vector.shape_cast %125 : vector<1x8x4xbf16> to vector<8x4xbf16>
    %cst_116 = arith.constant dense<0.000000e+00> : vector<8x80xf32>
    %127 = tpu.matmul %126, %124, %cst_116 {dimension_numbers = #tpu.dot_dimension_numbers<[1], [0], [0], [1], [0, 0, 1, 1], [], []>} : vector<8x4xbf16>, vector<4x80xbf16>, vector<8x80xf32> -> vector<8x80xf32>
    %128 = arith.addf %122, %127 : vector<8x80xf32>
    %c0_117 = arith.constant 0 : index
    %c21_118 = arith.constant 21 : index
    %129 = vector.load %arg7[%c0_117, %c21_118] : memref<4x102xf32, #tpu.memory_space<vmem>>, vector<4x80xf32>
    %130 = arith.truncf %129 : vector<4x80xf32> to vector<4x80xbf16>
    %c7_119 = arith.constant 7 : index
    %c0_120 = arith.constant 0 : index
    %c0_121 = arith.constant 0 : index
    %131 = vector.load %arg2[%c7_119, %c0_120, %c0_121] : memref<9x8x4xbf16, #tpu.memory_space<vmem>>, vector<1x8x4xbf16>
    %132 = vector.shape_cast %131 : vector<1x8x4xbf16> to vector<8x4xbf16>
    %cst_122 = arith.constant dense<0.000000e+00> : vector<8x80xf32>
    %133 = tpu.matmul %132, %130, %cst_122 {dimension_numbers = #tpu.dot_dimension_numbers<[1], [0], [0], [1], [0, 0, 1, 1], [], []>} : vector<8x4xbf16>, vector<4x80xbf16>, vector<8x80xf32> -> vector<8x80xf32>
    %134 = arith.addf %128, %133 : vector<8x80xf32>
    %c0_123 = arith.constant 0 : index
    %c22 = arith.constant 22 : index
    %135 = vector.load %arg7[%c0_123, %c22] : memref<4x102xf32, #tpu.memory_space<vmem>>, vector<4x80xf32>
    %136 = arith.truncf %135 : vector<4x80xf32> to vector<4x80xbf16>
    %c8_124 = arith.constant 8 : index
    %c0_125 = arith.constant 0 : index
    %c0_126 = arith.constant 0 : index
    %137 = vector.load %arg2[%c8_124, %c0_125, %c0_126] : memref<9x8x4xbf16, #tpu.memory_space<vmem>>, vector<1x8x4xbf16>
    %138 = vector.shape_cast %137 : vector<1x8x4xbf16> to vector<8x4xbf16>
    %cst_127 = arith.constant dense<0.000000e+00> : vector<8x80xf32>
    %139 = tpu.matmul %138, %136, %cst_127 {dimension_numbers = #tpu.dot_dimension_numbers<[1], [0], [0], [1], [0, 0, 1, 1], [], []>} : vector<8x4xbf16>, vector<4x80xbf16>, vector<8x80xf32> -> vector<8x80xf32>
    %140 = arith.addf %134, %139 : vector<8x80xf32>
    %c0_128 = arith.constant 0 : index
    %c0_129 = arith.constant 0 : index
    %141 = vector.load %arg3[%c0_128, %c0_129] : memref<8x1xf32, #tpu.memory_space<vmem>>, vector<8x1xf32>
    %142 = vector.broadcast %141 : vector<8x1xf32> to vector<8x80xf32>
    %143 = arith.addf %140, %142 : vector<8x80xf32>
    %cst_130 = arith.constant 0.000000e+00 : f32
    %144 = vector.broadcast %cst_130 : f32 to vector<8x80xf32>
    %145 = arith.maximumf %143, %144 : vector<8x80xf32>
    %cst_131 = arith.constant 0.000000e+00 : f32
    %146 = vector.broadcast %cst_131 : f32 to vector<8x11xf32>
    %c0_132 = arith.constant 0 : index
    %c0_133 = arith.constant 0 : index
    %147 = vector.load %arg8[%c0_132, %c0_133] : memref<8x102xf32, #tpu.memory_space<vmem>>, vector<8x11xf32>
    tpu.vector_store %arg8[%c0_132, %c0_133], %146 {strides = array<i32>} : memref<8x102xf32, #tpu.memory_space<vmem>>, vector<8x11xf32>,
    %cst_134 = arith.constant 0.000000e+00 : f32
    %148 = vector.broadcast %cst_134 : f32 to vector<8x11xf32>
    %c0_135 = arith.constant 0 : index
    %c91 = arith.constant 91 : index
    %149 = vector.load %arg8[%c0_135, %c91] : memref<8x102xf32, #tpu.memory_space<vmem>>, vector<8x11xf32>
    tpu.vector_store %arg8[%c0_135, %c91], %148 {strides = array<i32>} : memref<8x102xf32, #tpu.memory_space<vmem>>, vector<8x11xf32>,
    %c0_136 = arith.constant 0 : index
    %c11_137 = arith.constant 11 : index
    %150 = vector.load %arg8[%c0_136, %c11_137] : memref<8x102xf32, #tpu.memory_space<vmem>>, vector<8x80xf32>
    tpu.vector_store %arg8[%c0_136, %c11_137], %145 {strides = array<i32>} : memref<8x102xf32, #tpu.memory_space<vmem>>, vector<8x80xf32>,
    %cst_138 = arith.constant 0.000000e+00 : f32
    %151 = vector.broadcast %cst_138 : f32 to vector<8x2xf32>
    %c0_139 = arith.constant 0 : index
    %c19 = arith.constant 19 : index
    %152 = vector.load %arg8[%c0_139, %c19] : memref<8x102xf32, #tpu.memory_space<vmem>>, vector<8x2xf32>
    tpu.vector_store %arg8[%c0_139, %c19], %151 {strides = array<i32>} : memref<8x102xf32, #tpu.memory_space<vmem>>, vector<8x2xf32>,
    %cst_140 = arith.constant 0.000000e+00 : f32
    %153 = vector.broadcast %cst_140 : f32 to vector<8x2xf32>
    %c0_141 = arith.constant 0 : index
    %c29 = arith.constant 29 : index
    %154 = vector.load %arg8[%c0_141, %c29] : memref<8x102xf32, #tpu.memory_space<vmem>>, vector<8x2xf32>
    tpu.vector_store %arg8[%c0_141, %c29], %153 {strides = array<i32>} : memref<8x102xf32, #tpu.memory_space<vmem>>, vector<8x2xf32>,
    %cst_142 = arith.constant 0.000000e+00 : f32
    %155 = vector.broadcast %cst_142 : f32 to vector<8x2xf32>
    %c0_143 = arith.constant 0 : index
    %c39 = arith.constant 39 : index
    %156 = vector.load %arg8[%c0_143, %c39] : memref<8x102xf32, #tpu.memory_space<vmem>>, vector<8x2xf32>
    tpu.vector_store %arg8[%c0_143, %c39], %155 {strides = array<i32>} : memref<8x102xf32, #tpu.memory_space<vmem>>, vector<8x2xf32>,
    %cst_144 = arith.constant 0.000000e+00 : f32
    %157 = vector.broadcast %cst_144 : f32 to vector<8x2xf32>
    %c0_145 = arith.constant 0 : index
    %c49 = arith.constant 49 : index
    %158 = vector.load %arg8[%c0_145, %c49] : memref<8x102xf32, #tpu.memory_space<vmem>>, vector<8x2xf32>
    tpu.vector_store %arg8[%c0_145, %c49], %157 {strides = array<i32>} : memref<8x102xf32, #tpu.memory_space<vmem>>, vector<8x2xf32>,
    %cst_146 = arith.constant 0.000000e+00 : f32
    %159 = vector.broadcast %cst_146 : f32 to vector<8x2xf32>
    %c0_147 = arith.constant 0 : index
    %c59 = arith.constant 59 : index
    %160 = vector.load %arg8[%c0_147, %c59] : memref<8x102xf32, #tpu.memory_space<vmem>>, vector<8x2xf32>
    tpu.vector_store %arg8[%c0_147, %c59], %159 {strides = array<i32>} : memref<8x102xf32, #tpu.memory_space<vmem>>, vector<8x2xf32>,
    %cst_148 = arith.constant 0.000000e+00 : f32
    %161 = vector.broadcast %cst_148 : f32 to vector<8x2xf32>
    %c0_149 = arith.constant 0 : index
    %c69 = arith.constant 69 : index
    %162 = vector.load %arg8[%c0_149, %c69] : memref<8x102xf32, #tpu.memory_space<vmem>>, vector<8x2xf32>
    tpu.vector_store %arg8[%c0_149, %c69], %161 {strides = array<i32>} : memref<8x102xf32, #tpu.memory_space<vmem>>, vector<8x2xf32>,
    %cst_150 = arith.constant 0.000000e+00 : f32
    %163 = vector.broadcast %cst_150 : f32 to vector<8x2xf32>
    %c0_151 = arith.constant 0 : index
    %c79 = arith.constant 79 : index
    %164 = vector.load %arg8[%c0_151, %c79] : memref<8x102xf32, #tpu.memory_space<vmem>>, vector<8x2xf32>
    tpu.vector_store %arg8[%c0_151, %c79], %163 {strides = array<i32>} : memref<8x102xf32, #tpu.memory_space<vmem>>, vector<8x2xf32>,
    %cst_152 = arith.constant 0.000000e+00 : f32
    %165 = vector.broadcast %cst_152 : f32 to vector<8x2xf32>
    %c0_153 = arith.constant 0 : index
    %c89 = arith.constant 89 : index
    %166 = vector.load %arg8[%c0_153, %c89] : memref<8x102xf32, #tpu.memory_space<vmem>>, vector<8x2xf32>
    tpu.vector_store %arg8[%c0_153, %c89], %165 {strides = array<i32>} : memref<8x102xf32, #tpu.memory_space<vmem>>, vector<8x2xf32>,
    %c0_154 = arith.constant 0 : index
    %c0_155 = arith.constant 0 : index
    %167 = vector.load %arg8[%c0_154, %c0_155] : memref<8x102xf32, #tpu.memory_space<vmem>>, vector<8x80xf32>
    %168 = arith.truncf %167 : vector<8x80xf32> to vector<8x80xbf16>
    %c0_156 = arith.constant 0 : index
    %c0_157 = arith.constant 0 : index
    %c0_158 = arith.constant 0 : index
    %169 = vector.load %arg4[%c0_156, %c0_157, %c0_158] : memref<9x8x8xbf16, #tpu.memory_space<vmem>>, vector<1x8x8xbf16>
    %170 = vector.shape_cast %169 : vector<1x8x8xbf16> to vector<8x8xbf16>
    %cst_159 = arith.constant dense<0.000000e+00> : vector<8x80xf32>
    %171 = tpu.matmul %170, %168, %cst_159 {dimension_numbers = #tpu.dot_dimension_numbers<[1], [0], [0], [1], [0, 0, 1, 1], [], []>} : vector<8x8xbf16>, vector<8x80xbf16>, vector<8x80xf32> -> vector<8x80xf32>
    %c0_160 = arith.constant 0 : index
    %c1_161 = arith.constant 1 : index
    %172 = vector.load %arg8[%c0_160, %c1_161] : memref<8x102xf32, #tpu.memory_space<vmem>>, vector<8x80xf32>
    %173 = arith.truncf %172 : vector<8x80xf32> to vector<8x80xbf16>
    %c1_162 = arith.constant 1 : index
    %c0_163 = arith.constant 0 : index
    %c0_164 = arith.constant 0 : index
    %174 = vector.load %arg4[%c1_162, %c0_163, %c0_164] : memref<9x8x8xbf16, #tpu.memory_space<vmem>>, vector<1x8x8xbf16>
    %175 = vector.shape_cast %174 : vector<1x8x8xbf16> to vector<8x8xbf16>
    %cst_165 = arith.constant dense<0.000000e+00> : vector<8x80xf32>
    %176 = tpu.matmul %175, %173, %cst_165 {dimension_numbers = #tpu.dot_dimension_numbers<[1], [0], [0], [1], [0, 0, 1, 1], [], []>} : vector<8x8xbf16>, vector<8x80xbf16>, vector<8x80xf32> -> vector<8x80xf32>
    %177 = arith.addf %171, %176 : vector<8x80xf32>
    %c0_166 = arith.constant 0 : index
    %c2_167 = arith.constant 2 : index
    %178 = vector.load %arg8[%c0_166, %c2_167] : memref<8x102xf32, #tpu.memory_space<vmem>>, vector<8x80xf32>
    %179 = arith.truncf %178 : vector<8x80xf32> to vector<8x80xbf16>
    %c2_168 = arith.constant 2 : index
    %c0_169 = arith.constant 0 : index
    %c0_170 = arith.constant 0 : index
    %180 = vector.load %arg4[%c2_168, %c0_169, %c0_170] : memref<9x8x8xbf16, #tpu.memory_space<vmem>>, vector<1x8x8xbf16>
    %181 = vector.shape_cast %180 : vector<1x8x8xbf16> to vector<8x8xbf16>
    %cst_171 = arith.constant dense<0.000000e+00> : vector<8x80xf32>
    %182 = tpu.matmul %181, %179, %cst_171 {dimension_numbers = #tpu.dot_dimension_numbers<[1], [0], [0], [1], [0, 0, 1, 1], [], []>} : vector<8x8xbf16>, vector<8x80xbf16>, vector<8x80xf32> -> vector<8x80xf32>
    %183 = arith.addf %177, %182 : vector<8x80xf32>
    %c0_172 = arith.constant 0 : index
    %c10_173 = arith.constant 10 : index
    %184 = vector.load %arg8[%c0_172, %c10_173] : memref<8x102xf32, #tpu.memory_space<vmem>>, vector<8x80xf32>
    %185 = arith.truncf %184 : vector<8x80xf32> to vector<8x80xbf16>
    %c3_174 = arith.constant 3 : index
    %c0_175 = arith.constant 0 : index
    %c0_176 = arith.constant 0 : index
    %186 = vector.load %arg4[%c3_174, %c0_175, %c0_176] : memref<9x8x8xbf16, #tpu.memory_space<vmem>>, vector<1x8x8xbf16>
    %187 = vector.shape_cast %186 : vector<1x8x8xbf16> to vector<8x8xbf16>
    %cst_177 = arith.constant dense<0.000000e+00> : vector<8x80xf32>
    %188 = tpu.matmul %187, %185, %cst_177 {dimension_numbers = #tpu.dot_dimension_numbers<[1], [0], [0], [1], [0, 0, 1, 1], [], []>} : vector<8x8xbf16>, vector<8x80xbf16>, vector<8x80xf32> -> vector<8x80xf32>
    %189 = arith.addf %183, %188 : vector<8x80xf32>
    %c0_178 = arith.constant 0 : index
    %c11_179 = arith.constant 11 : index
    %190 = vector.load %arg8[%c0_178, %c11_179] : memref<8x102xf32, #tpu.memory_space<vmem>>, vector<8x80xf32>
    %191 = arith.truncf %190 : vector<8x80xf32> to vector<8x80xbf16>
    %c4_180 = arith.constant 4 : index
    %c0_181 = arith.constant 0 : index
    %c0_182 = arith.constant 0 : index
    %192 = vector.load %arg4[%c4_180, %c0_181, %c0_182] : memref<9x8x8xbf16, #tpu.memory_space<vmem>>, vector<1x8x8xbf16>
    %193 = vector.shape_cast %192 : vector<1x8x8xbf16> to vector<8x8xbf16>
    %cst_183 = arith.constant dense<0.000000e+00> : vector<8x80xf32>
    %194 = tpu.matmul %193, %191, %cst_183 {dimension_numbers = #tpu.dot_dimension_numbers<[1], [0], [0], [1], [0, 0, 1, 1], [], []>} : vector<8x8xbf16>, vector<8x80xbf16>, vector<8x80xf32> -> vector<8x80xf32>
    %195 = arith.addf %189, %194 : vector<8x80xf32>
    %c0_184 = arith.constant 0 : index
    %c12_185 = arith.constant 12 : index
    %196 = vector.load %arg8[%c0_184, %c12_185] : memref<8x102xf32, #tpu.memory_space<vmem>>, vector<8x80xf32>
    %197 = arith.truncf %196 : vector<8x80xf32> to vector<8x80xbf16>
    %c5_186 = arith.constant 5 : index
    %c0_187 = arith.constant 0 : index
    %c0_188 = arith.constant 0 : index
    %198 = vector.load %arg4[%c5_186, %c0_187, %c0_188] : memref<9x8x8xbf16, #tpu.memory_space<vmem>>, vector<1x8x8xbf16>
    %199 = vector.shape_cast %198 : vector<1x8x8xbf16> to vector<8x8xbf16>
    %cst_189 = arith.constant dense<0.000000e+00> : vector<8x80xf32>
    %200 = tpu.matmul %199, %197, %cst_189 {dimension_numbers = #tpu.dot_dimension_numbers<[1], [0], [0], [1], [0, 0, 1, 1], [], []>} : vector<8x8xbf16>, vector<8x80xbf16>, vector<8x80xf32> -> vector<8x80xf32>
    %201 = arith.addf %195, %200 : vector<8x80xf32>
    %c0_190 = arith.constant 0 : index
    %c20_191 = arith.constant 20 : index
    %202 = vector.load %arg8[%c0_190, %c20_191] : memref<8x102xf32, #tpu.memory_space<vmem>>, vector<8x80xf32>
    %203 = arith.truncf %202 : vector<8x80xf32> to vector<8x80xbf16>
    %c6_192 = arith.constant 6 : index
    %c0_193 = arith.constant 0 : index
    %c0_194 = arith.constant 0 : index
    %204 = vector.load %arg4[%c6_192, %c0_193, %c0_194] : memref<9x8x8xbf16, #tpu.memory_space<vmem>>, vector<1x8x8xbf16>
    %205 = vector.shape_cast %204 : vector<1x8x8xbf16> to vector<8x8xbf16>
    %cst_195 = arith.constant dense<0.000000e+00> : vector<8x80xf32>
    %206 = tpu.matmul %205, %203, %cst_195 {dimension_numbers = #tpu.dot_dimension_numbers<[1], [0], [0], [1], [0, 0, 1, 1], [], []>} : vector<8x8xbf16>, vector<8x80xbf16>, vector<8x80xf32> -> vector<8x80xf32>
    %207 = arith.addf %201, %206 : vector<8x80xf32>
    %c0_196 = arith.constant 0 : index
    %c21_197 = arith.constant 21 : index
    %208 = vector.load %arg8[%c0_196, %c21_197] : memref<8x102xf32, #tpu.memory_space<vmem>>, vector<8x80xf32>
    %209 = arith.truncf %208 : vector<8x80xf32> to vector<8x80xbf16>
    %c7_198 = arith.constant 7 : index
    %c0_199 = arith.constant 0 : index
    %c0_200 = arith.constant 0 : index
    %210 = vector.load %arg4[%c7_198, %c0_199, %c0_200] : memref<9x8x8xbf16, #tpu.memory_space<vmem>>, vector<1x8x8xbf16>
    %211 = vector.shape_cast %210 : vector<1x8x8xbf16> to vector<8x8xbf16>
    %cst_201 = arith.constant dense<0.000000e+00> : vector<8x80xf32>
    %212 = tpu.matmul %211, %209, %cst_201 {dimension_numbers = #tpu.dot_dimension_numbers<[1], [0], [0], [1], [0, 0, 1, 1], [], []>} : vector<8x8xbf16>, vector<8x80xbf16>, vector<8x80xf32> -> vector<8x80xf32>
    %213 = arith.addf %207, %212 : vector<8x80xf32>
    %c0_202 = arith.constant 0 : index
    %c22_203 = arith.constant 22 : index
    %214 = vector.load %arg8[%c0_202, %c22_203] : memref<8x102xf32, #tpu.memory_space<vmem>>, vector<8x80xf32>
    %215 = arith.truncf %214 : vector<8x80xf32> to vector<8x80xbf16>
    %c8_204 = arith.constant 8 : index
    %c0_205 = arith.constant 0 : index
    %c0_206 = arith.constant 0 : index
    %216 = vector.load %arg4[%c8_204, %c0_205, %c0_206] : memref<9x8x8xbf16, #tpu.memory_space<vmem>>, vector<1x8x8xbf16>
    %217 = vector.shape_cast %216 : vector<1x8x8xbf16> to vector<8x8xbf16>
    %cst_207 = arith.constant dense<0.000000e+00> : vector<8x80xf32>
    %218 = tpu.matmul %217, %215, %cst_207 {dimension_numbers = #tpu.dot_dimension_numbers<[1], [0], [0], [1], [0, 0, 1, 1], [], []>} : vector<8x8xbf16>, vector<8x80xbf16>, vector<8x80xf32> -> vector<8x80xf32>
    %219 = arith.addf %213, %218 : vector<8x80xf32>
    %c0_208 = arith.constant 0 : index
    %c0_209 = arith.constant 0 : index
    %220 = vector.load %arg5[%c0_208, %c0_209] : memref<8x1xf32, #tpu.memory_space<vmem>>, vector<8x1xf32>
    %221 = vector.broadcast %220 : vector<8x1xf32> to vector<8x80xf32>
    %222 = arith.addf %219, %221 : vector<8x80xf32>
    %cst_210 = arith.constant 0.000000e+00 : f32
    %223 = vector.broadcast %cst_210 : f32 to vector<8x80xf32>
    %224 = arith.maximumf %222, %223 : vector<8x80xf32>
    %c0_211 = arith.constant 0 : index
    %c0_212 = arith.constant 0 : index
    %c0_213 = arith.constant 0 : index
    %225 = vector.load %arg6[%c0_211, %c0_212, %c0_213] : memref<1x8x80xf32, #tpu.memory_space<vmem>>, vector<1x8x80xf32>
    %226 = vector.shape_cast %225 : vector<1x8x80xf32> to vector<8x80xf32>
    %227 = vector.shape_cast %224 : vector<8x80xf32> to vector<1x8x80xf32>
    tpu.vector_store %arg6[%c0_211, %c0_212, %c0_213], %227 {strides = array<i32>} : memref<1x8x80xf32, #tpu.memory_space<vmem>>, vector<1x8x80xf32>,
    return
  }
  func.func @transform_0(%arg0: i32) -> (i32, i32, i32, i32) {
    %c0_i32 = arith.constant 0 : i32
    %c0_i32_0 = arith.constant 0 : i32
    %c0_i32_1 = arith.constant 0 : i32
    %c0_i32_2 = arith.constant 0 : i32
    return %arg0, %c0_i32, %c0_i32_0, %c0_i32_1 : i32, i32, i32, i32
  }
  func.func @transform_1(%arg0: i32) -> (i32, i32, i32) {
    %c0_i32 = arith.constant 0 : i32
    %c0_i32_0 = arith.constant 0 : i32
    %c0_i32_1 = arith.constant 0 : i32
    %c0_i32_2 = arith.constant 0 : i32
    return %c0_i32, %c0_i32_0, %c0_i32_1 : i32, i32, i32
  }
  func.func @transform_2(%arg0: i32) -> (i32, i32) {
    %c0_i32 = arith.constant 0 : i32
    %c0_i32_0 = arith.constant 0 : i32
    %c0_i32_1 = arith.constant 0 : i32
    return %c0_i32, %c0_i32_0 : i32, i32
  }
  func.func @transform_3(%arg0: i32) -> (i32, i32, i32) {
    %c0_i32 = arith.constant 0 : i32
    %c0_i32_0 = arith.constant 0 : i32
    %c0_i32_1 = arith.constant 0 : i32
    %c0_i32_2 = arith.constant 0 : i32
    return %c0_i32, %c0_i32_0, %c0_i32_1 : i32, i32, i32
  }
  func.func @transform_4(%arg0: i32) -> (i32, i32) {
    %c0_i32 = arith.constant 0 : i32
    %c0_i32_0 = arith.constant 0 : i32
    %c0_i32_1 = arith.constant 0 : i32
    return %c0_i32, %c0_i32_0 : i32, i32
  }
  func.func @transform_5(%arg0: i32) -> (i32, i32, i32) {
    %c0_i32 = arith.constant 0 : i32
    %c0_i32_0 = arith.constant 0 : i32
    %c0_i32_1 = arith.constant 0 : i32
    return %arg0, %c0_i32, %c0_i32_0 : i32, i32, i32
  }
}

</mosaic_0001>

<bundles_post_ra>
// kernel: downsample_forward.1
= control target key start
LH: loop header
LB: loop body
LE: loop exit
PB: predicated region body
PF: predicated region fallthrough
CT: control target
= control target key end

     0   :  { %s3121_s18 = smov 0   ;;  %s3603_s0 = inlined_call_operand.vmem [shape: f32[2,4,16,16], index: 0, kind: input, shape index: {}]   ;;  %s3604_s1 = inlined_call_operand.vmem [shape: bf16[9,8,4], index: 1, kind: input, shape index: {}]   ;;  %s3605_s2 = inlined_call_operand.vmem [shape: f32[8,1], index: 2, kind: input, shape index: {}]   ;;  %s3606_s3 = inlined_call_operand.vmem [shape: bf16[9,8,8], index: 3, kind: input, shape index: {}]   ;;  %s3607_s4 = inlined_call_operand.vmem [shape: f32[8,1], index: 4, kind: input, shape index: {}]   ;;  %s3608_s5 = inlined_call_operand.vmem [shape: f32[2,8,80], index: 5, kind: output, shape index: {}]  }
   0x1 LB: > { %s2632_s19 = sadd.s32 4294967295, %s3069_s18   ;;  %p2636_p0 = scmp.ge.s32.totalorder %s3069_s18, 1  ;;  %s3069_s18 = sphi %s3121_s18, %s15_s18  }
   0x2   : > { %p187_p1 = scmp.lt.s32.totalorder %s3069_s18, 3 }
   0x4   : > { %p188_p2 = pnand %p2636_p0, %p187_p1 }
   0x5   : > { %p214_p3 = scmp.lt.s32.totalorder (!%p188_p2), %s2632_s19, 1  ;;  %s3074_s24 = smov (!%p188_p2), 11  }
   0x6   : > { %191 = sbr.rel (%p188_p2) target bundleno = 1219 (0x4c3), region = 40  ;;  %s3075_s25 = smov (!%p188_p2), 21  }
   0x7   : > { %s3076_s26 = smov (!%p188_p2), 31   ;;  %s3077_s27 = smov (!%p188_p2), 41  }
   0x8   : > { %s3078_s28 = smov (!%p188_p2), 51   ;;  %s3079_s29 = smov (!%p188_p2), 61  }
   0x9   : > { %s3080_s30 = smov (!%p188_p2), 71   ;;  %s3081_s6 = smov (!%p188_p2), 81  }
   0xa   : > { %s3082_s7 = smov (!%p188_p2), 126   ;;  %s3083_s8 = smov (!%p188_p2), 127  }
   0xb   : > { %v226_v0 = vlaneseq  ;;  %v3071_v1 = vmov 0.0   ;;  %vm3072_vm0 = vmmov 0   ;;  %s3618_s19 = smov (!%p214_p3, %s2632_s19), 1  ;;  %vm262_vm1 = vcmask 1041409   ;;  %s3084_s11 = smov 117  }
   0xc   : > { %2813 = vmatprep.subr.mxu0 %v3071_v1  ;;  %2820 = vmatprep.subr.mxu1 %v3071_v1  ;;  %s2728_s20 = sshll.u32 %s3618_s19, 6  ;;  %vm265_vm2 = vcmask 1042434   ;;  %vm268_vm5 = vcmask 1043459   ;;  %v3073_v11 = vmov 1.0   ;;  %vm270_vm8 = vcmask 130048   ;;  %s3085_s12 = smov 118  }
   0xd   : > { %v227_v2 = vshrl.u32 %v226_v0, 7  ;;  %v230_v3 = vand.u32 127, %v226_v0  ;;  %2817 = vmatprep.mubr.msk.f32.mxu0 %vm3072_vm0, %v3071_v1  ;;  %2824 = vmatprep.mubr.msk.f32.mxu1 %vm3072_vm0, %v3071_v1  ;;  %s3141_s23 = scalar_lea.vmem %s3603_s0, %s2728_s20  ;;  %vm224_vm9 = vcmask 830464   ;;  %vm418_vm10 = vcmask 150616   ;;  %s3086_s13 = smov 108  }
   0xe   : > { %v245_v9 = vld [vmem:[%s3141_s23] sm:$0x1]  ;;  %v246_v10 = vld [vmem:[%s3141_s23 + $0x10] sm:$0x1]  ;;  %v249_v14 = vld [vmem:[%s3141_s23 + $0x1] sm:$0x1] }
   0xf   : > { %v228_v4 = vadd.s32 8, %v227_v2  ;;  %v231_v5 = vmul.u32 2, %v230_v3  ;;  %v247_v12 = vld [vmem:[%s3141_s23 + $0x20] sm:$0x1]  ;;  %v248_v13 = vld [vmem:[%s3141_s23 + $0x30] sm:$0x1]  ;;  %v253_v20 = vmax.f32 %v245_v9, %v249_v14 }
  0x10   : > { %v250_v17 = vld [vmem:[%s3141_s23 + $0x11] sm:$0x1]  ;;  %v251_v18 = vld [vmem:[%s3141_s23 + $0x21] sm:$0x1]  ;;  %v420_v24 = vld [vmem:[%s3141_s23 + $0x2] sm:$0x1] }
  0x11   : > { %vm3143_vm3 = vcmp.eq.s32.totalorder %v228_v4, %v231_v5  ;;  %v238_v7 = vadd.s32 1, %v231_v5  ;;  %vm3147_vm4 = vcmp.eq.s32.totalorder %v227_v2, %v231_v5  ;;  %v252_v19 = vld [vmem:[%s3141_s23 + $0x31] sm:$0x1]  ;;  %v254_v21 = vmax.f32 %v246_v10, %v250_v17  ;;  %v421_v25 = vld [vmem:[%s3141_s23 + $0x12] sm:$0x1]  ;;  %s3087_s14 = smov 116  }
  0x12   : > { %2814 = vmatpush3.msk.msra.mxu0 %vm3143_vm3, %v3073_v11  ;;  %v255_v22 = vmax.f32 %v247_v12, %v251_v18  ;;  %v256_v23 = vmax.f32 %v248_v13, %v252_v19  ;;  %v422_v26 = vld [vmem:[%s3141_s23 + $0x22] sm:$0x1]  ;;  %v423_v27 = vld [vmem:[%s3141_s23 + $0x32] sm:$0x1]  ;;  %v424_v28 = vld [vmem:[%s3141_s23 + $0x3] sm:$0x1] }
  0x13   : > { %vm3159_vm6 = vcmp.eq.s32.totalorder %v228_v4, %v238_v7  ;;  %2815 = vmatprep.subr.mxu0 %v3071_v1  ;;  %vm3164_vm7 = vcmp.eq.s32.totalorder %v227_v2, %v238_v7  ;;  %v425_v29 = vld [vmem:[%s3141_s23 + $0x13] sm:$0x1]  ;;  %v261_v30 = vrot.slane %v254_v21, 7  ;;  %v426_v33 = vld [vmem:[%s3141_s23 + $0x23] sm:$0x1]  ;;  %v428_v35 = vmax.f32 %v420_v24, %v424_v28  ;;  %s3088_s15 = smov 106  }
  0x14   : > { %2821 = vmatpush3.msk.msra.mxu1 %vm3159_vm6, %v3073_v11  ;;  %2816 = vmatpush3.msk.msra.mxu0 %vm3147_vm4, %v3073_v11  ;;  %v264_v31 = vrot.slane %v255_v22, 6  ;;  %v267_v32 = vrot.slane %v256_v23, 5  ;;  %v427_v34 = vld [vmem:[%s3141_s23 + $0x33] sm:$0x1]  ;;  %v429_v36 = vmax.f32 %v421_v25, %v425_v29  ;;  %v430_v37 = vmax.f32 %v422_v26, %v426_v33  ;;  %v591_v38 = vld [vmem:[%s3141_s23 + $0x4] sm:$0x1] }
  0x15   : > { %2822 = vmatprep.subr.mxu1 %v3071_v1  ;;  %2827 = vmatprep.subr.mxu0 %v3071_v1  ;;  %v592_v39 = vld [vmem:[%s3141_s23 + $0x14] sm:$0x1]  ;;  %v263_v40 = vsel %vm262_vm1, %v261_v30, %v253_v20  ;;  %v431_v41 = vmax.f32 %v423_v27, %v427_v34  ;;  %v593_v42 = vld [vmem:[%s3141_s23 + $0x24] sm:$0x1]  ;;  %v595_v44 = vld [vmem:[%s3141_s23 + $0x5] sm:$0x1] }
  0x16   : > { %2823 = vmatpush3.msk.msra.mxu1 %vm3164_vm7, %v3073_v11  ;;  %v594_v43 = vld [vmem:[%s3141_s23 + $0x34] sm:$0x1]  ;;  %v266_v45 = vsel %vm265_vm2, %v264_v31, %v263_v40  ;;  %v436_v46 = vrot.slane %v429_v36, 7  ;;  %v438_v47 = vrot.slane %v430_v37, 6  ;;  %v596_v48 = vld [vmem:[%s3141_s23 + $0x15] sm:$0x1]  ;;  %v599_v50 = vmax.f32 %v591_v38, %v595_v44 }
  0x17   : > { %2834 = vmatprep.subr.mxu1 %v3071_v1  ;;  %v597_v49 = vld [vmem:[%s3141_s23 + $0x25] sm:$0x1]  ;;  %v269_v51 = vsel %vm268_vm5, %v267_v32, %v266_v45  ;;  %v440_v52 = vrot.slane %v431_v41, 5  ;;  %v598_v53 = vld [vmem:[%s3141_s23 + $0x35] sm:$0x1]  ;;  %v600_v54 = vmax.f32 %v592_v39, %v596_v48  ;;  %vm589_vm11 = vcmask 232616  }
  0x18   : > { %v601_v55 = vmax.f32 %v593_v42, %v597_v49  ;;  %2818 = vmatmul.mubr.msk.f32.vlgmr.msra.gmra.mxu0 %vm270_vm8, %v269_v51  ;;  %2825 = vmatmul.mubr.msk.f32.vlgmr.msra.gmra.mxu1 %vm270_vm8, %v269_v51  ;;  %v437_v56 = vsel %vm262_vm1, %v436_v46, %v428_v35  ;;  %v602_v57 = vmax.f32 %v594_v43, %v598_v53  ;;  %v762_v58 = vld [vmem:[%s3141_s23 + $0x6] sm:$0x1]  ;;  %v763_v59 = vld [vmem:[%s3141_s23 + $0x16] sm:$0x1]  ;;  %v766_v0 = vld [vmem:[%s3141_s23 + $0x7] sm:$0x1] }
  0x19   : > { %v764_v60 = vld [vmem:[%s3141_s23 + $0x26] sm:$0x1]  ;;  %2828 = vmatpush3.msk.msra.mxu0 %vm3143_vm3, %v3073_v11  ;;  %2835 = vmatpush3.msk.msra.mxu1 %vm3159_vm6, %v3073_v11  ;;  %v439_v61 = vsel %vm265_vm2, %v438_v47, %v437_v56  ;;  %v607_v62 = vrot.slane %v600_v54, 7  ;;  %v767_v2 = vld [vmem:[%s3141_s23 + $0x17] sm:$0x1]  ;;  %v770_v17 = vmax.f32 %v762_v58, %v766_v0  ;;  %vm760_vm12 = vcmask 314616  }
  0x1a   : > { %v609_v63 = vrot.slane %v601_v55, 6  ;;  %2829 = vmatprep.subr.mxu0 %v3071_v1  ;;  %2836 = vmatprep.subr.mxu1 %v3071_v1  ;;  %v441_v3 = vsel %vm268_vm5, %v440_v52, %v439_v61  ;;  %v768_v4 = vld [vmem:[%s3141_s23 + $0x27] sm:$0x1]  ;;  %v771_v5 = vmax.f32 %v763_v59, %v767_v2  ;;  %v765_v9 = vld [vmem:[%s3141_s23 + $0x36] sm:$0x1]  ;;  %v611_v14 = vrot.slane %v602_v57, 5 }
  0x1b   : > { %2830 = vmatpush3.msk.msra.mxu0 %vm3147_vm4, %v3073_v11  ;;  %2831 = vmatprep.mubr.msk.f32.mxu0 %vm3072_vm0, %v3071_v1  ;;  %v608_v7 = vsel %vm262_vm1, %v607_v62, %v599_v50  ;;  %v769_v10 = vld [vmem:[%s3141_s23 + $0x37] sm:$0x1]  ;;  %v772_v12 = vmax.f32 %v764_v60, %v768_v4  ;;  %v934_v13 = vld [vmem:[%s3141_s23 + $0x18] sm:$0x1]  ;;  %v938_v20 = vld [vmem:[%s3141_s23 + $0x19] sm:$0x1] }
  0x1c   : > { %2837 = vmatpush3.msk.msra.mxu1 %vm3164_vm7, %v3073_v11  ;;  %2838 = vmatprep.mubr.msk.f32.mxu1 %vm3072_vm0, %v3071_v1  ;;  %v778_v18 = vrot.slane %v771_v5, 7  ;;  %v610_v19 = vsel %vm265_vm2, %v609_v63, %v608_v7  ;;  %v773_v21 = vmax.f32 %v765_v9, %v769_v10  ;;  %v935_v22 = vld [vmem:[%s3141_s23 + $0x28] sm:$0x1]  ;;  %v939_v23 = vld [vmem:[%s3141_s23 + $0x29] sm:$0x1]  ;;  %v942_v24 = vmax.f32 %v934_v13, %v938_v20  ;;  %s3089_s16 = smov 107  }
  0x1d   : > { %2832 = vmatmul.mubr.msk.f32.vlgmr.msra.gmra.mxu0 %vm270_vm8, %v441_v3  ;;  %2839 = vmatmul.mubr.msk.f32.vlgmr.msra.gmra.mxu1 %vm270_vm8, %v441_v3  ;;  %v780_v25 = vrot.slane %v772_v12, 6  ;;  %v933_v26 = vld [vmem:[%s3141_s23 + $0x8] sm:$0x1]  ;;  %v937_v27 = vld [vmem:[%s3141_s23 + $0x9] sm:$0x1]  ;;  %v612_v28 = vsel %vm268_vm5, %v611_v14, %v610_v19  ;;  %v943_v32 = vmax.f32 %v935_v22, %v939_v23  ;;  %vm931_vm13 = vcmask 396616  }
  0x1e   : > { %2841 = vmatprep.subr.mxu0 %v3071_v1  ;;  %2848 = vmatprep.subr.mxu1 %v3071_v1  ;;  %v779_v29 = vsel %vm262_vm1, %v778_v18, %v770_v17  ;;  %v936_v30 = vld [vmem:[%s3141_s23 + $0x38] sm:$0x1]  ;;  %v940_v31 = vld [vmem:[%s3141_s23 + $0x39] sm:$0x1]  ;;  %v1105_v33 = vld [vmem:[%s3141_s23 + $0x1a] sm:$0x1]  ;;  %v941_v36 = vmax.f32 %v933_v26, %v937_v27 }
  0x1f   : > { %2842 = vmatpush3.msk.msra.mxu0 %vm3143_vm3, %v3073_v11  ;;  %2849 = vmatpush3.msk.msra.mxu1 %vm3159_vm6, %v3073_v11  ;;  %v1109_v34 = vld [vmem:[%s3141_s23 + $0x1b] sm:$0x1]  ;;  %v782_v35 = vrot.slane %v773_v21, 5  ;;  %v949_v37 = vrot.slane %v942_v24, 7  ;;  %v781_v38 = vsel %vm265_vm2, %v780_v25, %v779_v29  ;;  %v944_v39 = vmax.f32 %v936_v30, %v940_v31  ;;  %v1106_v40 = vld [vmem:[%s3141_s23 + $0x2a] sm:$0x1] }
  0x20   : > { %2843 = vmatprep.subr.mxu0 %v3071_v1  ;;  %2850 = vmatprep.subr.mxu1 %v3071_v1  ;;  %v1110_v41 = vld [vmem:[%s3141_s23 + $0x2b] sm:$0x1]  ;;  %v1113_v42 = vmax.f32 %v1105_v33, %v1109_v34  ;;  %v951_v43 = vrot.slane %v943_v32, 6  ;;  %v1104_v44 = vld [vmem:[%s3141_s23 + $0xa] sm:$0x1]  ;;  %vm1102_vm14 = vcmask 478616  }
  0x21   : > { %2844 = vmatpush3.msk.msra.mxu0 %vm3147_vm4, %v3073_v11  ;;  %2845 = vmatprep.mubr.msk.f32.mxu0 %vm3072_vm0, %v3071_v1  ;;  %v1108_v45 = vld [vmem:[%s3141_s23 + $0xb] sm:$0x1]  ;;  %v783_v46 = vsel %vm268_vm5, %v782_v35, %v781_v38  ;;  %v950_v47 = vsel %vm262_vm1, %v949_v37, %v941_v36  ;;  %v1107_v48 = vld [vmem:[%s3141_s23 + $0x3a] sm:$0x1]  ;;  %v1111_v49 = vld [vmem:[%s3141_s23 + $0x3b] sm:$0x1]  ;;  %v1114_v50 = vmax.f32 %v1106_v40, %v1110_v41 }
  0x22   : > { %2851 = vmatpush3.msk.msra.mxu1 %vm3164_vm7, %v3073_v11  ;;  %2852 = vmatprep.mubr.msk.f32.mxu1 %vm3072_vm0, %v3071_v1  ;;  %v1276_v51 = vld [vmem:[%s3141_s23 + $0x1c] sm:$0x1]  ;;  %v1280_v52 = vld [vmem:[%s3141_s23 + $0x1d] sm:$0x1]  ;;  %v953_v53 = vrot.slane %v944_v39, 5  ;;  %v1112_v54 = vmax.f32 %v1104_v44, %v1108_v45  ;;  %v1120_v55 = vrot.slane %v1113_v42, 7  ;;  %v952_v56 = vsel %vm265_vm2, %v951_v43, %v950_v47 }
  0x23   : > { %2846 = vmatmul.mubr.msk.f32.vlgmr.msra.gmra.mxu0 %vm270_vm8, %v612_v28  ;;  %2853 = vmatmul.mubr.msk.f32.vlgmr.msra.gmra.mxu1 %vm270_vm8, %v612_v28  ;;  %v1115_v57 = vmax.f32 %v1107_v48, %v1111_v49  ;;  %v1277_v58 = vld [vmem:[%s3141_s23 + $0x2c] sm:$0x1]  ;;  %v1281_v59 = vld [vmem:[%s3141_s23 + $0x2d] sm:$0x1]  ;;  %v1284_v60 = vmax.f32 %v1276_v51, %v1280_v52  ;;  %v1122_v61 = vrot.slane %v1114_v50, 6  ;;  %vm1273_vm15 = vcmask 560616  }
  0x24   : > { %2855 = vmatprep.subr.mxu0 %v3071_v1  ;;  %2862 = vmatprep.subr.mxu1 %v3071_v1  ;;  %v1275_v62 = vld [vmem:[%s3141_s23 + $0xc] sm:$0x1]  ;;  %v1279_v63 = vld [vmem:[%s3141_s23 + $0xd] sm:$0x1]  ;;  %v954_v0 = vsel %vm268_vm5, %v953_v53, %v952_v56  ;;  %v1121_v2 = vsel %vm262_vm1, %v1120_v55, %v1112_v54  ;;  %v1278_v3 = vld [vmem:[%s3141_s23 + $0x3c] sm:$0x1]  ;;  %v1285_v5 = vmax.f32 %v1277_v58, %v1281_v59 }
  0x25   : > { %2856 = vmatpush3.msk.msra.mxu0 %vm3143_vm3, %v3073_v11  ;;  %2863 = vmatpush3.msk.msra.mxu1 %vm3159_vm6, %v3073_v11  ;;  %v1282_v4 = vld [vmem:[%s3141_s23 + $0x3d] sm:$0x1]  ;;  %v1447_v7 = vld [vmem:[%s3141_s23 + $0x1e] sm:$0x1]  ;;  %v1451_v9 = vld [vmem:[%s3141_s23 + $0x1f] sm:$0x1]  ;;  %v1283_v12 = vmax.f32 %v1275_v62, %v1279_v63  ;;  %v1123_v14 = vsel %vm265_vm2, %v1122_v61, %v1121_v2 }
  0x26   : > { %2857 = vmatprep.subr.mxu0 %v3071_v1  ;;  %2864 = vmatprep.subr.mxu1 %v3071_v1  ;;  %v1124_v10 = vrot.slane %v1115_v57, 5  ;;  %v1291_v13 = vrot.slane %v1284_v60, 7  ;;  %v1286_v17 = vmax.f32 %v1278_v3, %v1282_v4  ;;  %v1448_v18 = vld [vmem:[%s3141_s23 + $0x2e] sm:$0x1]  ;;  %v1452_v19 = vld [vmem:[%s3141_s23 + $0x2f] sm:$0x1]  ;;  %v1455_v20 = vmax.f32 %v1447_v7, %v1451_v9 }
  0x27   : > { %2858 = vmatpush3.msk.msra.mxu0 %vm3147_vm4, %v3073_v11  ;;  %2859 = vmatprep.mubr.msk.f32.mxu0 %vm3072_vm0, %v3071_v1  ;;  %v1293_v21 = vrot.slane %v1285_v5, 6  ;;  %v1446_v22 = vld [vmem:[%s3141_s23 + $0xe] sm:$0x1]  ;;  %v1450_v23 = vld [vmem:[%s3141_s23 + $0xf] sm:$0x1]  ;;  %v1456_v28 = vmax.f32 %v1448_v18, %v1452_v19  ;;  %s2639_s20 = sshll.u32 %s3618_s19, 3 }
  0x28   : > { %2865 = vmatpush3.msk.msra.mxu1 %vm3164_vm7, %v3073_v11  ;;  %2866 = vmatprep.mubr.msk.f32.mxu1 %vm3072_vm0, %v3071_v1  ;;  %v1125_v24 = vsel %vm268_vm5, %v1124_v10, %v1123_v14  ;;  %v1292_v25 = vsel %vm262_vm1, %v1291_v13, %v1283_v12  ;;  %v1449_v26 = vld [vmem:[%s3141_s23 + $0x3e] sm:$0x1]  ;;  %v1453_v27 = vld [vmem:[%s3141_s23 + $0x3f] sm:$0x1]  ;;  %v1295_v29 = vrot.slane %v1286_v17, 5  ;;  %v1454_v30 = vmax.f32 %v1446_v22, %v1450_v23 }
  0x29   : > { %2860 = vmatmul.mubr.msk.f32.vlgmr.msra.gmra.mxu0 %vm270_vm8, %v783_v46  ;;  %2867 = vmatmul.mubr.msk.f32.vlgmr.msra.gmra.mxu1 %vm270_vm8, %v783_v46  ;;  %v1462_v31 = vrot.slane %v1455_v20, 7  ;;  %v1294_v32 = vsel %vm265_vm2, %v1293_v21, %v1292_v25  ;;  %v1457_v33 = vmax.f32 %v1449_v26, %v1453_v27  ;;  %v1464_v34 = vrot.slane %v1456_v28, 6  ;;  %225 = vst.msk [vmem:[#allocation2] sm:$0xf] %vm224_vm9, %v3071_v1  ;;  %v1619_v28 = vld [vmem:[%s3604_s1] sm:$0xf] }
  0x2a   : > { %2869 = vmatprep.subr.mxu0 %v3071_v1  ;;  %2876 = vmatprep.subr.mxu1 %v3071_v1  ;;  %v1296_v35 = vsel %vm268_vm5, %v1295_v29, %v1294_v32  ;;  %v2076_v29 = vld [vmem:[%s3605_s2] sm:$0xff]  ;;  %vm2096_vm9 = vcmask 253160  }
  0x2b   : > { %2870 = vmatpush3.msk.msra.mxu0 %vm3143_vm3, %v3073_v11  ;;  %2877 = vmatpush3.msk.msra.mxu1 %vm3159_vm6, %v3073_v11  ;;  %v1463_v36 = vsel %vm262_vm1, %v1462_v31, %v1454_v30  ;;  %v1466_v37 = vrot.slane %v1457_v33, 5  ;;  %vm1444_vm1 = vcmask 642616   ;;  %v3090_v30 = vmov 0  }
  0x2c   : > { %2871 = vmatprep.subr.mxu0 %v3071_v1  ;;  %2878 = vmatprep.subr.mxu1 %v3071_v1  ;;  %v1465_v38 = vsel %vm265_vm2, %v1464_v34, %v1463_v36  ;;  %vm1615_vm2 = vcmask 724616   ;;  %v2692_v34 = vld [vmem:[%s3604_s1 + $0x4] sm:$0xf] }
  0x2d   : > { %2872 = vmatpush3.msk.msra.mxu0 %vm3147_vm4, %v3073_v11  ;;  %2873 = vmatprep.mubr.msk.f32.mxu0 %vm3072_vm0, %v3071_v1  ;;  %v1467_v39 = vsel %vm268_vm5, %v1466_v37, %v1465_v38  ;;  %v2697_v38 = vld [vmem:[%s3604_s1 + $0xc] sm:$0xf]  ;;  %vm2084_vm5 = vcmask 89088  }
  0x2e   : > { %2879 = vmatpush3.msk.msra.mxu1 %vm3164_vm7, %v3073_v11  ;;  %2880 = vmatprep.mubr.msk.f32.mxu1 %vm3072_vm0, %v3071_v1  ;;  %2085 = vst.msk [vmem:[#allocation3] sm:$0xff] %vm2084_vm5, %v3071_v1 }
  0x2f   : > { %2874 = vmatmul.mubr.msk.f32.vlgmr.msra.gmra.mxu0 %vm270_vm8, %v954_v0  ;;  %2881 = vmatmul.mubr.msk.f32.vlgmr.msra.gmra.mxu1 %vm270_vm8, %v954_v0 }
  0x30   : > { %2883 = vmatprep.subr.mxu0 %v3071_v1  ;;  %2890 = vmatprep.subr.mxu1 %v3071_v1 }
  0x31   : > { %2884 = vmatpush3.msk.msra.mxu0 %vm3143_vm3, %v3073_v11  ;;  %2891 = vmatpush3.msk.msra.mxu1 %vm3159_vm6, %v3073_v11 }
  0x32   : > { %2885 = vmatprep.subr.mxu0 %v3071_v1  ;;  %2892 = vmatprep.subr.mxu1 %v3071_v1 }
  0x33   : > { %2886 = vmatpush3.msk.msra.mxu0 %vm3147_vm4, %v3073_v11  ;;  %2887 = vmatprep.mubr.msk.f32.mxu0 %vm3072_vm0, %v3071_v1 }
  0x34   : > { %2893 = vmatpush3.msk.msra.mxu1 %vm3164_vm7, %v3073_v11  ;;  %2894 = vmatprep.mubr.msk.f32.mxu1 %vm3072_vm0, %v3071_v1 }
  0x35   : > { %2888 = vmatmul.mubr.msk.f32.vlgmr.msra.gmra.mxu0 %vm270_vm8, %v1125_v24  ;;  %2895 = vmatmul.mubr.msk.f32.vlgmr.msra.gmra.mxu1 %vm270_vm8, %v1125_v24 }
  0x36   : > { %2897 = vmatprep.subr.mxu0 %v3071_v1  ;;  %2904 = vmatprep.subr.mxu1 %v3071_v1 }
  0x37   : > { %2898 = vmatpush3.msk.msra.mxu0 %vm3143_vm3, %v3073_v11  ;;  %2905 = vmatpush3.msk.msra.mxu1 %vm3159_vm6, %v3073_v11 }
  0x38   : > { %2899 = vmatprep.subr.mxu0 %v3071_v1  ;;  %2906 = vmatprep.subr.mxu1 %v3071_v1 }
  0x39   : > { %2900 = vmatpush3.msk.msra.mxu0 %vm3147_vm4, %v3073_v11  ;;  %2901 = vmatprep.mubr.msk.f32.mxu0 %vm3072_vm0, %v3071_v1 }
  0x3a   : > { %2907 = vmatpush3.msk.msra.mxu1 %vm3164_vm7, %v3073_v11  ;;  %2908 = vmatprep.mubr.msk.f32.mxu1 %vm3072_vm0, %v3071_v1 }
  0x3b   : > { %2902 = vmatmul.mubr.msk.f32.vlgmr.msra.gmra.mxu0 %vm270_vm8, %v1296_v35  ;;  %2909 = vmatmul.mubr.msk.f32.vlgmr.msra.gmra.mxu1 %vm270_vm8, %v1296_v35 }
  0x3c   : > { %2911 = vmatprep.subr.mxu0 %v3071_v1  ;;  %2918 = vmatprep.subr.mxu1 %v3071_v1 }
  0x3d   : > { %2912 = vmatpush3.msk.msra.mxu0 %vm3143_vm3, %v3073_v11  ;;  %2919 = vmatpush3.msk.msra.mxu1 %vm3159_vm6, %v3073_v11  ;;  %vm1629_vm3 = vcmask 1041408   ;;  %vm2086_vm6 = vcmask 835288  }
  0x3e   : > { %2913 = vmatprep.subr.mxu0 %v3071_v1  ;;  %2920 = vmatprep.subr.mxu1 %v3071_v1  ;;  %2087 = vst.msk [vmem:[#allocation3] sm:$0xff] %vm2086_vm6, %v3071_v1 }
  0x3f   : > { %2914 = vmatpush3.msk.msra.mxu0 %vm3147_vm4, %v3073_v11  ;;  %2915 = vmatprep.mubr.msk.f32.mxu0 %vm3072_vm0, %v3071_v1  ;;  %vm1625_vm4 = vcmask 31744  }
  0x40   : > { %2921 = vmatpush3.msk.msra.mxu1 %vm3164_vm7, %v3073_v11  ;;  %2922 = vmatprep.mubr.msk.f32.mxu1 %vm3072_vm0, %v3071_v1  ;;  %vm2092_vm7 = vcmask 744536  }
  0x41   : > { %2916 = vmatmul.mubr.msk.f32.vlgmr.msra.gmra.mxu0 %vm270_vm8, %v1467_v39  ;;  %2923 = vmatmul.mubr.msk.f32.vlgmr.msra.gmra.mxu1 %vm270_vm8, %v1467_v39  ;;  %vm2094_vm8 = vcmask 171160  }
  0x42   : > { %2931 = vmatprep.subr.bf16.mxu1 %v3071_v1  ;;  %2933 = vmatprep.mubr.msk.bf16.mxu1 %vm3072_vm0, %v3071_v1 }
  0x43   : > { %2925 = vmatprep.subr.bf16.mxu0 %v3071_v1  ;;  %2927 = vmatprep.mubr.msk.bf16.mxu0 %vm3072_vm0, %v3071_v1 }
  0x44   : > { %3061 = vset.pattern.permute.xlu0 %v3090_v30  ;;  %3062 = vset.pattern.permute.xlu1 %v3090_v30 }
  0xd8   : > { %v339_v6 = vpop.f32.mrf.mxu0  ;;  %v409_v8 = vpop.f32.mrf.mxu1 }
  0xd9   : > { %v413_v11 = vmax.f32 %v339_v6, %v409_v8 }
  0xda   : > { %v2819_v15 = vpop.f32.mrf.mxu0  ;;  %v2826_v16 = vpop.f32.mrf.mxu1 }
  0xdb   : > { %415 = vrot.lane.b32.xlu0 %v413_v11, %s3074_s24  ;;  %v2695_v11 = vld [vmem:[%s3604_s1 + $0x8] sm:$0xf] }
  0xdd   : > { %v510_v40 = vpop.f32.mrf.mxu0  ;;  %v580_v41 = vpop.f32.mrf.mxu1 }
  0xde   : > { %v584_v42 = vmax.f32 %v510_v40, %v580_v41  ;;  %v2701_v40 = vld [vmem:[%s3604_s1 + $0x14] sm:$0xf] }
  0xdf   : > { %v2833_v43 = vpop.f32.mrf.mxu0  ;;  %v2840_v44 = vpop.f32.mrf.mxu1 }
  0xe0   : > { %586 = vrot.lane.b32.xlu0 %v584_v42, %s3075_s25  ;;  %v2699_v43 = vld [vmem:[%s3604_s1 + $0x10] sm:$0xf] }
  0xe3   : > { %v681_v45 = vpop.f32.mrf.mxu0  ;;  %v751_v46 = vpop.f32.mrf.mxu1 }
  0xe4   : > { %v755_v47 = vmax.f32 %v681_v45, %v751_v46  ;;  %v2705_v45 = vld [vmem:[%s3604_s1 + $0x1c] sm:$0xf] }
  0xe5   : > { %v2847_v48 = vpop.f32.mrf.mxu0  ;;  %v2854_v49 = vpop.f32.mrf.mxu1 }
  0xe6   : > { %757 = vrot.lane.b32.xlu1 %v755_v47, %s3076_s26  ;;  %v2703_v47 = vld [vmem:[%s3604_s1 + $0x18] sm:$0xf]  ;;  %v2707_v49 = vld [vmem:[%s3604_s1 + $0x20] sm:$0xf] }
  0xe9   : > { %v852_v50 = vpop.f32.mrf.mxu0  ;;  %v922_v51 = vpop.f32.mrf.mxu1 }
  0xea   : > { %v926_v52 = vmax.f32 %v852_v50, %v922_v51 }
  0xeb   : > { %v2861_v53 = vpop.f32.mrf.mxu0  ;;  %v2868_v54 = vpop.f32.mrf.mxu1 }
  0xec   : > { %928 = vrot.lane.b32.xlu1 %v926_v52, %s3077_s27 }
  0xef   : > { %v1023_v55 = vpop.f32.mrf.mxu0  ;;  %v1093_v56 = vpop.f32.mrf.mxu1 }
  0xf0   : > { %v1097_v57 = vmax.f32 %v1023_v55, %v1093_v56 }
  0xf1   : > { %v2875_v58 = vpop.f32.mrf.mxu0  ;;  %v2882_v59 = vpop.f32.mrf.mxu1 }
  0xf2   : > { %1099 = vrot.lane.b32.xlu0 %v1097_v57, %s3078_s28 }
  0xf5   : > { %v1194_v60 = vpop.f32.mrf.mxu0  ;;  %v1264_v61 = vpop.f32.mrf.mxu1 }
  0xf6   : > { %v1268_v62 = vmax.f32 %v1194_v60, %v1264_v61 }
  0xf7   : > { %v2889_v63 = vpop.f32.mrf.mxu0  ;;  %v2896_v0 = vpop.f32.mrf.mxu1 }
  0xf8   : > { %1270 = vrot.lane.b32.xlu1 %v1268_v62, %s3079_s29 }
  0xfb   : > { %v1365_v2 = vpop.f32.mrf.mxu0  ;;  %v1435_v3 = vpop.f32.mrf.mxu1 }
  0xfc   : > { %v1439_v4 = vmax.f32 %v1365_v2, %v1435_v3 }
  0xfd   : > { %v2903_v5 = vpop.f32.mrf.mxu0  ;;  %v2910_v7 = vpop.f32.mrf.mxu1 }
  0xfe   : > { %1441 = vrot.lane.b32.xlu0 %v1439_v4, %s3080_s30 }
 0x101   : > { %v1536_v9 = vpop.f32.mrf.mxu0  ;;  %v1606_v10 = vpop.f32.mrf.mxu1 }
 0x102   : > { %v1610_v12 = vmax.f32 %v1536_v9, %v1606_v10 }
 0x103   : > { %v2917_v13 = vpop.f32.mrf.mxu0  ;;  %v2924_v14 = vpop.f32.mrf.mxu1 }
 0x104   : > { %1612 = vrot.lane.b32.xlu1 %v1610_v12, %s3081_s6 }
 0x14d   : > { %v416_v17 = vpop.permute.xlu0 %415 }
 0x14e   : > { %419 = vst.msk [vmem:[#allocation2] sm:$0xf] %vm418_vm10, %v416_v17  ;;  %vm2098_vm10 = vcmask 335160  }
 0x152   : > { %v587_v18 = vpop.permute.xlu0 %586 }
 0x153   : > { %590 = vst.msk [vmem:[#allocation2] sm:$0xf] %vm589_vm11, %v587_v18  ;;  %vm2100_vm11 = vcmask 417160  }
 0x158   : > { %v758_v19 = vpop.permute.xlu1 %757 }
 0x159   : > { %761 = vst.msk [vmem:[#allocation2] sm:$0xf] %vm760_vm12, %v758_v19  ;;  %vm2102_vm12 = vcmask 499160  }
 0x15e   : > { %v929_v20 = vpop.permute.xlu1 %928 }
 0x15f   : > { %932 = vst.msk [vmem:[#allocation2] sm:$0xf] %vm931_vm13, %v929_v20  ;;  %vm2104_vm13 = vcmask 581160  }
 0x164   : > { %v1100_v21 = vpop.permute.xlu0 %1099 }
 0x165   : > { %1103 = vst.msk [vmem:[#allocation2] sm:$0xf] %vm1102_vm14, %v1100_v21  ;;  %vm2106_vm14 = vcmask 663160  }
 0x16a   : > { %v1271_v22 = vpop.permute.xlu1 %1270 }
 0x16b   : > { %1274 = vst.msk [vmem:[#allocation2] sm:$0xf] %vm1273_vm15, %v1271_v22  ;;  %vm2108_vm15 = vcmask 745160  }
 0x170   : > { %v1442_v23 = vpop.permute.xlu0 %1441 }
 0x171   : > { %1445 = vst.msk [vmem:[#allocation2] sm:$0xf] %vm1444_vm1, %v1442_v23  ;;  %vm2122_vm1 = vcmask 1043456  }
 0x176   : > { %v1613_v24 = vpop.permute.xlu1 %1612 }
 0x177   : > { %1616 = vst.msk [vmem:[#allocation2] sm:$0xf] %vm1615_vm2, %v1613_v24  ;;  %vm2118_vm2 = vcmask 64512  }
 0x17e   : > { %v1617_v25 = vld [vmem:[#allocation2] sm:$0xf] }
 0x17f   : > { %v1618_v26 = vpack.c.bf16 %v1617_v25, %v1617_v25 }
 0x181   : > { %1721 = vrot.lane.b32.xlu1 %v1618_v26, %s3082_s7  ;;  %1623 = vrot.lane.b32.xlu0 %v1618_v26, %s3083_s8  ;;  %v1677_v27 = vsel %vm1629_vm3, %v1618_v26, 0 }
 0x182   : > { %2932 = vmatpush3.bf16.msra.mxu1 %v1677_v27 }
 0x183   : > { %2943 = vmatprep.subr.bf16.mxu1 %v3071_v1 }
 0x185   : > { %1823 = vrot.lane.b32.xlu1 %v1618_v26, %s3084_s11  ;;  %1772 = vrot.lane.b32.xlu0 %v1618_v26, %s3085_s12 }
 0x186   : > { %2934 = vmatmul.mubr.msk.bf16.vlgmr.msra.gmra.mxu1 %vm1625_vm4, %v1619_v28 }
 0x187   : > { %2945 = vmatprep.mubr.msk.bf16.mxu1 %vm3072_vm0, %v3071_v1 }
 0x189   : > { %1925 = vrot.lane.b32.xlu1 %v1618_v26, %s3086_s13  ;;  %1874 = vrot.lane.b32.xlu0 %v1618_v26, %s3087_s14 }
 0x18d   : > { %2027 = vrot.lane.b32.xlu1 %v1618_v26, %s3088_s15  ;;  %1976 = vrot.lane.b32.xlu0 %v1618_v26, %s3089_s16 }
 0x191   : > { %2079 = vperm.xlu0 %3061, %v2076_v29  }
 0x1f3   : > { %v1624_v31 = vpop.permute.xlu0 %1623  ;;  %v1722_v33 = vpop.permute.xlu1 %1721 }
 0x1f4   : > { %v1631_v32 = vsel %vm1629_vm3, %v1624_v31, 0  ;;  %v1727_v36 = vsel %vm1629_vm3, %v1722_v33, 0 }
 0x1f5   : > { %2926 = vmatpush3.bf16.msra.mxu0 %v1631_v32 }
 0x1f6   : > { %2937 = vmatprep.subr.bf16.mxu0 %v3071_v1 }
 0x1f7   : > { %v1773_v35 = vpop.permute.xlu0 %1772  ;;  %v1824_v8 = vpop.permute.xlu1 %1823 }
 0x1f8   : > { %v1778_v37 = vsel %vm1629_vm3, %v1773_v35, 0  ;;  %2928 = vmatmul.mubr.msk.bf16.vlgmr.msra.gmra.mxu0 %vm1625_vm4, %v2692_v34  ;;  %v1829_v15 = vsel %vm1629_vm3, %v1824_v8, 0 }
 0x1f9   : > { %2938 = vmatpush3.bf16.msra.mxu0 %v1727_v36  ;;  %2944 = vmatpush3.bf16.msra.mxu1 %v1778_v37 }
 0x1fa   : > { %2955 = vmatprep.subr.bf16.mxu1 %v3071_v1  ;;  %2939 = vmatprep.mubr.msk.bf16.mxu0 %vm3072_vm0, %v3071_v1 }
 0x1fb   : > { %v1875_v39 = vpop.permute.xlu0 %1874  ;;  %2949 = vmatprep.subr.bf16.mxu0 %v3071_v1  ;;  %v1926_v42 = vpop.permute.xlu1 %1925 }
 0x1fc   : > { %v1880_v6 = vsel %vm1629_vm3, %v1875_v39, 0  ;;  %2946 = vmatmul.mubr.msk.bf16.vlgmr.msra.gmra.mxu1 %vm1625_vm4, %v2697_v38  ;;  %v1931_v44 = vsel %vm1629_vm3, %v1926_v42, 0 }
 0x1fd   : > { %2956 = vmatpush3.bf16.msra.mxu1 %v1880_v6  ;;  %2957 = vmatprep.mubr.msk.bf16.mxu1 %vm3072_vm0, %v3071_v1 }
 0x1fe   : > { %2967 = vmatprep.subr.bf16.mxu1 %v3071_v1 }
 0x1ff   : > { %v1977_v16 = vpop.permute.xlu0 %1976  ;;  %v2028_v46 = vpop.permute.xlu1 %2027 }
 0x200   : > { %2940 = vmatmul.mubr.msk.bf16.vlgmr.msra.gmra.mxu0 %vm1625_vm4, %v2695_v11  ;;  %v1982_v41 = vsel %vm1629_vm3, %v1977_v16, 0  ;;  %v2033_v48 = vsel %vm1629_vm3, %v2028_v46, 0  ;;  %v2569_v16 = vld [vmem:[%s3607_s4] sm:$0xff] }
 0x201   : > { %2950 = vmatpush3.bf16.msra.mxu0 %v1829_v15  ;;  %2951 = vmatprep.mubr.msk.bf16.mxu0 %vm3072_vm0, %v3071_v1  ;;  %v2112_v15 = vld [vmem:[%s3606_s3] sm:$0xf] }
 0x202   : > { %2961 = vmatprep.subr.bf16.mxu0 %v3071_v1 }
 0x204   : > { %2958 = vmatmul.mubr.msk.bf16.vlgmr.msra.gmra.mxu1 %vm1625_vm4, %v2701_v40 }
 0x205   : > { %2968 = vmatpush3.bf16.msra.mxu1 %v1982_v41  ;;  %2969 = vmatprep.mubr.msk.bf16.mxu1 %vm3072_vm0, %v3071_v1 }
 0x206   : > { %2979 = vmatprep.subr.bf16.mxu1 %v3071_v1 }
 0x208   : > { %2952 = vmatmul.mubr.msk.bf16.vlgmr.msra.gmra.mxu0 %vm1625_vm4, %v2699_v43  ;;  %v2709_v43 = vld [vmem:[%s3606_s3 + $0x4] sm:$0xf] }
 0x209   : > { %2962 = vmatpush3.bf16.msra.mxu0 %v1931_v44  ;;  %2963 = vmatprep.mubr.msk.bf16.mxu0 %vm3072_vm0, %v3071_v1 }
 0x20a   : > { %2973 = vmatprep.subr.bf16.mxu0 %v3071_v1 }
 0x20c   : > { %2970 = vmatmul.mubr.msk.bf16.vlgmr.msra.gmra.mxu1 %vm1625_vm4, %v2705_v45  ;;  %v2080_v32 = vpop.permute.xlu0 %2079 }
 0x20d   : > { %2981 = vmatprep.mubr.msk.bf16.mxu1 %vm3072_vm0, %v3071_v1 }
 0x210   : > { %2964 = vmatmul.mubr.msk.bf16.vlgmr.msra.gmra.mxu0 %vm1625_vm4, %v2703_v47  ;;  %v2714_v47 = vld [vmem:[%s3606_s3 + $0xc] sm:$0xf] }
 0x211   : > { %2974 = vmatpush3.bf16.msra.mxu0 %v2033_v48  ;;  %2975 = vmatprep.mubr.msk.bf16.mxu0 %vm3072_vm0, %v3071_v1 }
 0x212   : > { %2985 = vmatprep.subr.bf16.mxu0 %v3071_v1 }
 0x218   : > { %2976 = vmatmul.mubr.msk.bf16.vlgmr.msra.gmra.mxu0 %vm1625_vm4, %v2707_v49 }
 0x219   : > { %2987 = vmatprep.mubr.msk.bf16.mxu0 %vm3072_vm0, %v3071_v1 }
 0x246   : > { %v1713_v50 = vpop.f32.mrf.mxu1 }
 0x248   : > { %v2935_v51 = vpop.f32.mrf.mxu1 }
 0x249   : > { %v2712_v51 = vld [vmem:[%s3606_s3 + $0x8] sm:$0xf] }
 0x24a   : > { %v1716_v52 = vpop.f32.mrf.mxu1 }
 0x24c   : > { %v2936_v53 = vpop.f32.mrf.mxu1 }
 0x2b8   : > { %v1667_v54 = vpop.f32.mrf.mxu0 }
 0x2b9   : > { %v1714_v3 = vadd.f32 %v1713_v50, %v1667_v54  ;;  %v2718_v54 = vld [vmem:[%s3606_s3 + $0x14] sm:$0xf] }
 0x2ba   : > { %v2929_v55 = vpop.f32.mrf.mxu0 }
 0x2bc   : > { %v1670_v56 = vpop.f32.mrf.mxu0  ;;  %v1814_v57 = vpop.f32.mrf.mxu1 }
 0x2be   : > { %v2930_v58 = vpop.f32.mrf.mxu0  ;;  %v2947_v59 = vpop.f32.mrf.mxu1 }
 0x2bf   : > { %v2722_v59 = vld [vmem:[%s3606_s3 + $0x1c] sm:$0xf] }
 0x2c0   : > { %v1763_v60 = vpop.f32.mrf.mxu0  ;;  %v1817_v61 = vpop.f32.mrf.mxu1 }
 0x2c1   : > { %v1769_v7 = vadd.f32 %v1763_v60, %v1714_v3  ;;  %v2720_v61 = vld [vmem:[%s3606_s3 + $0x18] sm:$0xf] }
 0x2c2   : > { %v2941_v62 = vpop.f32.mrf.mxu0  ;;  %v2948_v63 = vpop.f32.mrf.mxu1 }
 0x2c3   : > { %v1820_v14 = vadd.f32 %v1814_v57, %v1769_v7  ;;  %v2716_v57 = vld [vmem:[%s3606_s3 + $0x10] sm:$0xf]  ;;  %v2724_v63 = vld [vmem:[%s3606_s3 + $0x20] sm:$0xf] }
 0x2c4   : > { %v1766_v0 = vpop.f32.mrf.mxu0  ;;  %v1916_v2 = vpop.f32.mrf.mxu1 }
 0x2c6   : > { %v2942_v4 = vpop.f32.mrf.mxu0  ;;  %v2959_v5 = vpop.f32.mrf.mxu1 }
 0x2c8   : > { %v1865_v9 = vpop.f32.mrf.mxu0  ;;  %v1919_v10 = vpop.f32.mrf.mxu1 }
 0x2c9   : > { %v1871_v19 = vadd.f32 %v1865_v9, %v1820_v14 }
 0x2ca   : > { %v2953_v12 = vpop.f32.mrf.mxu0  ;;  %v2960_v13 = vpop.f32.mrf.mxu1 }
 0x2cb   : > { %v1922_v24 = vadd.f32 %v1916_v2, %v1871_v19 }
 0x2cc   : > { %v1868_v17 = vpop.f32.mrf.mxu0  ;;  %v2018_v18 = vpop.f32.mrf.mxu1 }
 0x2ce   : > { %v2954_v20 = vpop.f32.mrf.mxu0  ;;  %v2971_v21 = vpop.f32.mrf.mxu1 }
 0x2d0   : > { %v1967_v22 = vpop.f32.mrf.mxu0  ;;  %v2021_v23 = vpop.f32.mrf.mxu1 }
 0x2d1   : > { %v1973_v27 = vadd.f32 %v1967_v22, %v1922_v24 }
 0x2d2   : > { %v2965_v25 = vpop.f32.mrf.mxu0  ;;  %v2972_v26 = vpop.f32.mrf.mxu1 }
 0x2d3   : > { %v2024_v30 = vadd.f32 %v2018_v18, %v1973_v27 }
 0x2d4   : > { %v1970_v28 = vpop.f32.mrf.mxu0 }
 0x2d6   : > { %v2966_v29 = vpop.f32.mrf.mxu0 }
 0x2d8   : > { %v2069_v31 = vpop.f32.mrf.mxu0 }
 0x2d9   : > { %v2075_v33 = vadd.f32 %v2069_v31, %v2024_v30 }
 0x2da   : > { %v2977_v34 = vpop.f32.mrf.mxu0 }
 0x2db   : > { %v2082_v35 = vadd.f32 %v2080_v32, %v2075_v33 }
 0x2dc   : > { %v2072_v36 = vpop.f32.mrf.mxu0 }
 0x2dd   : > { %v2083_v37 = vmax.f32 %v2082_v35, 0.0 }
 0x2de   : > { %v2978_v38 = vpop.f32.mrf.mxu0 }
 0x2df   : > { %2089 = vrot.lane.b32.xlu1 %v2083_v37, %s3074_s24  ;;  %s222_s24 = scalar_lea.vmem %s3608_s5, %s2639_s20 }
 0x351   : > { %v2090_v39 = vpop.permute.xlu1 %2089 }
 0x352   : > { %2093 = vst.msk [vmem:[#allocation3] sm:$0xff] %vm2092_vm7, %v2090_v39 }
 0x353   : > { %2095 = vst.msk [vmem:[#allocation3] sm:$0xff] %vm2094_vm8, %v3071_v1 }
 0x354   : > { %2097 = vst.msk [vmem:[#allocation3] sm:$0xff] %vm2096_vm9, %v3071_v1 }
 0x355   : > { %2099 = vst.msk [vmem:[#allocation3] sm:$0xff] %vm2098_vm10, %v3071_v1 }
 0x356   : > { %2101 = vst.msk [vmem:[#allocation3] sm:$0xff] %vm2100_vm11, %v3071_v1 }
 0x357   : > { %2103 = vst.msk [vmem:[#allocation3] sm:$0xff] %vm2102_vm12, %v3071_v1 }
 0x358   : > { %2105 = vst.msk [vmem:[#allocation3] sm:$0xff] %vm2104_vm13, %v3071_v1 }
 0x359   : > { %2107 = vst.msk [vmem:[#allocation3] sm:$0xff] %vm2106_vm14, %v3071_v1 }
 0x35a   : > { %2109 = vst.msk [vmem:[#allocation3] sm:$0xff] %vm2108_vm15, %v3071_v1 }
 0x361   : > { %v2110_v6 = vld [vmem:[#allocation3] sm:$0xff] }
 0x362   : > { %v2111_v8 = vpack.c.bf16 %v2110_v6, %v2110_v6 }
 0x364   : > { %2116 = vrot.lane.b32.xlu1 %v2111_v8, %s3083_s8  ;;  %2214 = vrot.lane.b32.xlu0 %v2111_v8, %s3082_s7  ;;  %v2170_v11 = vsel %vm2122_vm1, %v2111_v8, 0 }
 0x365   : > { %2986 = vmatpush3.bf16.msra.mxu0 %v2170_v11 }
 0x366   : > { %2997 = vmatprep.subr.bf16.mxu0 %v3071_v1 }
 0x368   : > { %2265 = vrot.lane.b32.xlu1 %v2111_v8, %s3085_s12  ;;  %2316 = vrot.lane.b32.xlu0 %v2111_v8, %s3084_s11 }
 0x369   : > { %2988 = vmatmul.mubr.msk.bf16.vlgmr.msra.gmra.mxu0 %vm2118_vm2, %v2112_v15 }
 0x36a   : > { %2999 = vmatprep.mubr.msk.bf16.mxu0 %vm3072_vm0, %v3071_v1 }
 0x36c   : > { %2367 = vrot.lane.b32.xlu1 %v2111_v8, %s3087_s14  ;;  %2418 = vrot.lane.b32.xlu0 %v2111_v8, %s3086_s13 }
 0x370   : > { %2469 = vrot.lane.b32.xlu1 %v2111_v8, %s3089_s16  ;;  %2520 = vrot.lane.b32.xlu0 %v2111_v8, %s3088_s15 }
 0x374   : > { %2572 = vperm.xlu1 %3062, %v2569_v16  }
 0x3d6   : > { %v2117_v40 = vpop.permute.xlu1 %2116  ;;  %v2215_v41 = vpop.permute.xlu0 %2214 }
 0x3d7   : > { %v2124_v42 = vsel %vm2122_vm1, %v2117_v40, 0  ;;  %v2220_v44 = vsel %vm2122_vm1, %v2215_v41, 0 }
 0x3d8   : > { %2980 = vmatpush3.bf16.msra.mxu1 %v2124_v42 }
 0x3d9   : > { %2991 = vmatprep.subr.bf16.mxu1 %v3071_v1 }
 0x3da   : > { %v2266_v45 = vpop.permute.xlu1 %2265  ;;  %v2317_v48 = vpop.permute.xlu0 %2316 }
 0x3db   : > { %2982 = vmatmul.mubr.msk.bf16.vlgmr.msra.gmra.mxu1 %vm2118_vm2, %v2709_v43  ;;  %v2271_v46 = vsel %vm2122_vm1, %v2266_v45, 0  ;;  %v2322_v52 = vsel %vm2122_vm1, %v2317_v48, 0 }
 0x3dc   : > { %2992 = vmatpush3.bf16.msra.mxu1 %v2220_v44  ;;  %2993 = vmatprep.mubr.msk.bf16.mxu1 %vm3072_vm0, %v3071_v1 }
 0x3dd   : > { %2998 = vmatpush3.bf16.msra.mxu0 %v2271_v46  ;;  %3003 = vmatprep.subr.bf16.mxu1 %v3071_v1 }
 0x3de   : > { %v2368_v49 = vpop.permute.xlu1 %2367  ;;  %3009 = vmatprep.subr.bf16.mxu0 %v3071_v1  ;;  %v2419_v55 = vpop.permute.xlu0 %2418 }
 0x3df   : > { %v2373_v50 = vsel %vm2122_vm1, %v2368_v49, 0  ;;  %v2424_v58 = vsel %vm2122_vm1, %v2419_v55, 0 }
 0x3e0   : > { %3000 = vmatmul.mubr.msk.bf16.vlgmr.msra.gmra.mxu0 %vm2118_vm2, %v2714_v47 }
 0x3e1   : > { %3010 = vmatpush3.bf16.msra.mxu0 %v2373_v50  ;;  %3011 = vmatprep.mubr.msk.bf16.mxu0 %vm3072_vm0, %v3071_v1 }
 0x3e2   : > { %3021 = vmatprep.subr.bf16.mxu0 %v3071_v1  ;;  %v2470_v53 = vpop.permute.xlu1 %2469  ;;  %v2521_v60 = vpop.permute.xlu0 %2520 }
 0x3e3   : > { %2994 = vmatmul.mubr.msk.bf16.vlgmr.msra.gmra.mxu1 %vm2118_vm2, %v2712_v51  ;;  %v2475_v56 = vsel %vm2122_vm1, %v2470_v53, 0  ;;  %v2526_v62 = vsel %vm2122_vm1, %v2521_v60, 0 }
 0x3e4   : > { %3004 = vmatpush3.bf16.msra.mxu1 %v2322_v52  ;;  %3005 = vmatprep.mubr.msk.bf16.mxu1 %vm3072_vm0, %v3071_v1 }
 0x3e5   : > { %3015 = vmatprep.subr.bf16.mxu1 %v3071_v1 }
 0x3e8   : > { %3012 = vmatmul.mubr.msk.bf16.vlgmr.msra.gmra.mxu0 %vm2118_vm2, %v2718_v54 }
 0x3e9   : > { %3022 = vmatpush3.bf16.msra.mxu0 %v2475_v56  ;;  %3023 = vmatprep.mubr.msk.bf16.mxu0 %vm3072_vm0, %v3071_v1 }
 0x3eb   : > { %3006 = vmatmul.mubr.msk.bf16.vlgmr.msra.gmra.mxu1 %vm2118_vm2, %v2716_v57 }
 0x3ec   : > { %3016 = vmatpush3.bf16.msra.mxu1 %v2424_v58  ;;  %3017 = vmatprep.mubr.msk.bf16.mxu1 %vm3072_vm0, %v3071_v1 }
 0x3ed   : > { %3027 = vmatprep.subr.bf16.mxu1 %v3071_v1 }
 0x3ef   : > { %v2573_v40 = vpop.permute.xlu1 %2572 }
 0x3f0   : > { %3024 = vmatmul.mubr.msk.bf16.vlgmr.msra.gmra.mxu0 %vm2118_vm2, %v2722_v59 }
 0x3f3   : > { %3018 = vmatmul.mubr.msk.bf16.vlgmr.msra.gmra.mxu1 %vm2118_vm2, %v2720_v61 }
 0x3f4   : > { %3028 = vmatpush3.bf16.msra.mxu1 %v2526_v62  ;;  %3029 = vmatprep.mubr.msk.bf16.mxu1 %vm3072_vm0, %v3071_v1  ;;  %vm2577_vm0 = vcmask 654336  }
 0x3fb   : > { %3030 = vmatmul.mubr.msk.bf16.vlgmr.msra.gmra.mxu1 %vm2118_vm2, %v2724_v63 }
 0x429   : > { %v2206_v0 = vpop.f32.mrf.mxu0 }
 0x42b   : > { %v2989_v2 = vpop.f32.mrf.mxu0 }
 0x42d   : > { %v2209_v3 = vpop.f32.mrf.mxu0 }
 0x42f   : > { %v2990_v4 = vpop.f32.mrf.mxu0 }
 0x49b   : > { %v2160_v5 = vpop.f32.mrf.mxu1 }
 0x49c   : > { %v2207_v20 = vadd.f32 %v2206_v0, %v2160_v5 }
 0x49d   : > { %v2983_v7 = vpop.f32.mrf.mxu1 }
 0x49f   : > { %v2163_v9 = vpop.f32.mrf.mxu1 }
 0x4a0   : > { %v2307_v10 = vpop.f32.mrf.mxu0 }
 0x4a1   : > { %v2984_v12 = vpop.f32.mrf.mxu1 }
 0x4a2   : > { %v3001_v13 = vpop.f32.mrf.mxu0 }
 0x4a3   : > { %v2256_v14 = vpop.f32.mrf.mxu1 }
 0x4a4   : > { %v2310_v17 = vpop.f32.mrf.mxu0  ;;  %v2262_v23 = vadd.f32 %v2256_v14, %v2207_v20 }
 0x4a5   : > { %v2995_v18 = vpop.f32.mrf.mxu1 }
 0x4a6   : > { %v3002_v1 = vpop.f32.mrf.mxu0  ;;  %v2313_v28 = vadd.f32 %v2307_v10, %v2262_v23 }
 0x4a7   : > { %v2259_v19 = vpop.f32.mrf.mxu1 }
 0x4a8   : > { %v2409_v21 = vpop.f32.mrf.mxu0 }
 0x4a9   : > { %v2996_v22 = vpop.f32.mrf.mxu1 }
 0x4aa   : > { %v3013_v24 = vpop.f32.mrf.mxu0 }
 0x4ab   : > { %v2358_v25 = vpop.f32.mrf.mxu1 }
 0x4ac   : > { %v2412_v26 = vpop.f32.mrf.mxu0  ;;  %v2364_v31 = vadd.f32 %v2358_v25, %v2313_v28 }
 0x4ad   : > { %v3007_v27 = vpop.f32.mrf.mxu1 }
 0x4ae   : > { %v3014_v29 = vpop.f32.mrf.mxu0  ;;  %v2415_v36 = vadd.f32 %v2409_v21, %v2364_v31 }
 0x4af   : > { %v2361_v30 = vpop.f32.mrf.mxu1 }
 0x4b0   : > { %v2511_v32 = vpop.f32.mrf.mxu0 }
 0x4b1   : > { %v3008_v33 = vpop.f32.mrf.mxu1 }
 0x4b2   : > { %v3025_v34 = vpop.f32.mrf.mxu0 }
 0x4b3   : > { %v2460_v35 = vpop.f32.mrf.mxu1 }
 0x4b4   : > { %v2514_v37 = vpop.f32.mrf.mxu0  ;;  %v2466_v39 = vadd.f32 %v2460_v35, %v2415_v36 }
 0x4b5   : > { %v3019_v38 = vpop.f32.mrf.mxu1 }
 0x4b6   : > { %v3026_v6 = vpop.f32.mrf.mxu0  ;;  %v2517_v15 = vadd.f32 %v2511_v32, %v2466_v39 }
 0x4b7   : > { %v2463_v8 = vpop.f32.mrf.mxu1 }
 0x4b9   : > { %v3020_v11 = vpop.f32.mrf.mxu1 }
 0x4bb   : > { %v2562_v16 = vpop.f32.mrf.mxu1 }
 0x4bc   : > { %v2568_v41 = vadd.f32 %v2562_v16, %v2517_v15 }
 0x4bd   : > { %v3031_v42 = vpop.f32.mrf.mxu1 }
 0x4be   : > { %v2575_v43 = vadd.f32 %v2573_v40, %v2568_v41 }
 0x4bf   : > { %v2565_v44 = vpop.f32.mrf.mxu1 }
 0x4c0   : > { %v2576_v45 = vmax.f32 %v2575_v43, 0.0 }
 0x4c1   : > { %v3032_v46 = vpop.f32.mrf.mxu1 }
 0x4c2   : > { %2578 = vst.msk [vmem:[%s222_s24] sm:$0xff] %vm2577_vm0, %v2576_v45 }
 0x4c3 PF: > { %s15_s18 = sadd.s32 1, %s3069_s18  }
 0x4c4   : > { %p12_p4 = scmp.ge.s32.totalorder %s15_s18, 4  }
 0x4c6   :  { %14 = sbr.rel (!%p12_p4) target bundleno = 1 (0x1), region = 86 }

</bundles_post_ra>
